<compile_context>
chip_gen: v6e
topology: v6e:2x2x1
jax: 0.10.0
libtpu: 0.0.40
codegen_flags: <defaults>
</compile_context>

<pallas_src>
import functools

import jax
import jax.numpy as jnp
from jax.experimental import pallas as pl
from jax.experimental.pallas import tpu as pltpu


# ----------------------------------------------------------------------------
# Fused kernel: one grid step per batch element, everything resident in VMEM.
# ----------------------------------------------------------------------------
def _fused_attention_kernel(*refs, num_heads, scale, eps, sr_ratio):
    if sr_ratio > 1:
        (x_ref, xp_ref, qw_ref, kvw_ref, srw_ref, srb_ref,
         lng_ref, lnb_ref, pw_ref, pb_ref, o_ref) = refs
    else:
        (x_ref, qw_ref, kvw_ref, pw_ref, pb_ref, o_ref) = refs

    f32 = jnp.float32
    x = x_ref[0]                                  # (N, C) bf16 MXU operand
    N, C = x.shape
    hd = C // num_heads
    mxu_dtype = x.dtype

    # ---- q projection (qkv_bias=False -> no bias add) ----------------------
    # Fold the attention scale into q once (cheaper than scaling every
    # per-head (N, Nk) score tile; identical math up to fp reordering).
    q = jnp.dot(x, qw_ref[...], preferred_element_type=f32) * scale  # (N, C)

    # ---- spatial reduction: conv-as-matmul + LayerNorm (f32 elementwise) ---
    if sr_ratio > 1:
        xp = xp_ref[0]                            # (Nk, sr*sr*C) bf16
        xs = jnp.dot(xp, srw_ref[...], preferred_element_type=f32)
        xs = xs + srb_ref[...].astype(f32)                          # (Nk, C)
        mean = jnp.mean(xs, axis=-1, keepdims=True)
        var = jnp.mean(jnp.square(xs - mean), axis=-1, keepdims=True)
        xs = (xs - mean) * jax.lax.rsqrt(var + eps)
        xs = xs * lng_ref[...].astype(f32) + lnb_ref[...].astype(f32)
        kv_in = xs.astype(mxu_dtype)
    else:
        kv_in = x                                 # (N, C) bf16

    # ---- kv projection (no bias) -------------------------------------------
    kv = jnp.dot(kv_in, kvw_ref[...], preferred_element_type=f32)  # (Nk, 2C)
    k = kv[:, :C]
    v = kv[:, C:]
    v_mxu = v.astype(mxu_dtype)

    # ---- multi-head attention: heads as static column slices ---------------
    # contract last dim of q-head with last dim of k-head (no k transpose)
    dnums = (((1,), (1,)), ((), ()))
    heads = []
    for h in range(num_heads):
        sl = slice(h * hd, (h + 1) * hd)
        qh = q[:, sl].astype(mxu_dtype)           # (N, hd)
        kh = k[:, sl].astype(mxu_dtype)           # (Nk, hd)
        s = jax.lax.dot_general(qh, kh, dnums,
                                preferred_element_type=f32)           # (N, Nk)
        s = s - jnp.max(s, axis=-1, keepdims=True)
        p = jnp.exp(s)
        p = p * pl.reciprocal(jnp.sum(p, axis=-1, keepdims=True), approx=True)
        oh = jnp.dot(p.astype(mxu_dtype), v_mxu[:, sl],
                     preferred_element_type=f32)                      # (N, hd)
        heads.append(oh.astype(mxu_dtype))        # bf16 -> cheaper lane concat
    o = jnp.concatenate(heads, axis=-1)           # (N, C) bf16, lane-dense

    # ---- output projection (attn_drop / proj_drop are p=0.0 -> identity) ---
    out = jnp.dot(o, pw_ref[...], preferred_element_type=f32)
    out = out + pb_ref[...].astype(f32)
    o_ref[0] = out.astype(o_ref.dtype)            # lane-dense (N, C) store


# ----------------------------------------------------------------------------
# Wrapper: trace-time layout prep + single pallas_call.
# ----------------------------------------------------------------------------
def attention_forward(x, params, *, num_heads, sr_ratio,
                      search_H, search_W, template_H, template_W,
                      mxu_dtype=jnp.bfloat16):
    B, N, C = x.shape
    hd = C // num_heads
    scale = hd ** (-0.5)
    out_dtype = x.dtype

    # MXU operands in bf16; accumulation / elementwise stays f32 in-kernel.
    x_mxu = x.astype(mxu_dtype)
    qw = params["q_w"].astype(mxu_dtype)
    kvw = params["kv_w"].astype(mxu_dtype)
    pw = params["proj_w"].astype(mxu_dtype)
    pb = params["proj_b"].reshape(1, C).astype(jnp.float32)

    if sr_ratio > 1:
        Ns = search_H * search_W
        P = sr_ratio * sr_ratio * C

        def patchify(tokens, Hh, Ww):
            # tokens: (B, Hh*Ww, C), row-major -> non-overlapping sr x sr
            # patches flattened as (ki, kj, C) fastest-varying C.
            Ho, Wo = Hh // sr_ratio, Ww // sr_ratio
            p = tokens.reshape(B, Ho, sr_ratio, Wo, sr_ratio, C)
            p = p.transpose(0, 1, 3, 2, 4, 5)
            return p.reshape(B, Ho * Wo, P)

        xp = jnp.concatenate(
            [patchify(x_mxu[:, :Ns, :], search_H, search_W),
             patchify(x_mxu[:, Ns:, :], template_H, template_W)], axis=1)
        Nk = xp.shape[1]

        srw = params["sr_w"].astype(mxu_dtype)
        srb = params["sr_b"].reshape(1, C).astype(jnp.float32)
        lng = params["ln_g"].reshape(1, C).astype(jnp.float32)
        lnb = params["ln_b"].reshape(1, C).astype(jnp.float32)

        in_specs = [
            pl.BlockSpec((1, N, C), lambda b: (b, 0, 0)),     # x (per batch)
            pl.BlockSpec((1, Nk, P), lambda b: (b, 0, 0)),    # sr patches
            pl.BlockSpec((C, C), lambda b: (0, 0)),           # q_w
            pl.BlockSpec((C, 2 * C), lambda b: (0, 0)),       # kv_w
            pl.BlockSpec((P, C), lambda b: (0, 0)),           # sr_w (folded)
            pl.BlockSpec((1, C), lambda b: (0, 0)),           # sr_b
            pl.BlockSpec((1, C), lambda b: (0, 0)),           # ln_g
            pl.BlockSpec((1, C), lambda b: (0, 0)),           # ln_b
            pl.BlockSpec((C, C), lambda b: (0, 0)),           # proj_w
            pl.BlockSpec((1, C), lambda b: (0, 0)),           # proj_b
        ]
        args = (x_mxu, xp, qw, kvw, srw, srb, lng, lnb, pw, pb)
    else:
        in_specs = [
            pl.BlockSpec((1, N, C), lambda b: (b, 0, 0)),
            pl.BlockSpec((C, C), lambda b: (0, 0)),
            pl.BlockSpec((C, 2 * C), lambda b: (0, 0)),
            pl.BlockSpec((C, C), lambda b: (0, 0)),
            pl.BlockSpec((1, C), lambda b: (0, 0)),
        ]
        args = (x_mxu, qw, kvw, pw, pb)

    kernel = functools.partial(
        _fused_attention_kernel,
        num_heads=num_heads, scale=scale, eps=1e-5, sr_ratio=sr_ratio)

    return pl.pallas_call(
        kernel,
        out_shape=jax.ShapeDtypeStruct((B, N, C), out_dtype),
        grid=(B,),
        in_specs=in_specs,
        out_specs=pl.BlockSpec((1, N, C), lambda b: (b, 0, 0)),
        compiler_params=pltpu.CompilerParams(
            dimension_semantics=("parallel",)),
    )(*args)


# ----------------------------------------------------------------------------
# Pure-JAX f32 reference (for a loose numerical sanity check).
# ----------------------------------------------------------------------------
def attention_reference(x, params, *, num_heads, sr_ratio,
                        search_H, search_W, template_H, template_W):
    B, N, C = x.shape
    hd = C // num_heads
    scale = hd ** (-0.5)
    hp = jax.lax.Precision.HIGHEST

    q = jnp.dot(x.reshape(B * N, C), params["q_w"], precision=hp)
    q = q.reshape(B, N, num_heads, hd).transpose(0, 2, 1, 3)

    if sr_ratio > 1:
        Ns = search_H * search_W

        def sr_branch(tokens, Hh, Ww):
            Ho, Wo = Hh // sr_ratio, Ww // sr_ratio
            p = tokens.reshape(B, Ho, sr_ratio, Wo, sr_ratio, C)
            p = p.transpose(0, 1, 3, 2, 4, 5)
            p = p.reshape(B * Ho * Wo, sr_ratio * sr_ratio * C)
            y = jnp.dot(p, params["sr_w"], precision=hp) + params["sr_b"]
            mean = y.mean(-1, keepdims=True)
            var = jnp.square(y - mean).mean(-1, keepdims=True)
            y = (y - mean) * jax.lax.rsqrt(var + 1e-5)
            y = y * params["ln_g"] + params["ln_b"]
            return y.reshape(B, Ho * Wo, C)

        x_ = jnp.concatenate([sr_branch(x[:, :Ns, :], search_H, search_W),
                              sr_branch(x[:, Ns:, :], template_H, template_W)],
                             axis=1)
    else:
        x_ = x

    Nk = x_.shape[1]
    kv = jnp.dot(x_.reshape(B * Nk, C), params["kv_w"], precision=hp)
    kv = kv.reshape(B, Nk, 2, num_heads, hd).transpose(2, 0, 3, 1, 4)
    k, v = kv[0], kv[1]

    s = jnp.einsum("bhqd,bhkd->bhqk", q, k, precision=hp) * scale
    p = jax.nn.softmax(s, axis=-1)
    o = jnp.einsum("bhqk,bhkd->bhqd", p, v, precision=hp)
    o = o.transpose(0, 2, 1, 3).reshape(B * N, C)
    out = jnp.dot(o, params["proj_w"], precision=hp) + params["proj_b"]
    return out.reshape(B, N, C)


# ----------------------------------------------------------------------------
# Params (synthetic; nn.Linear weights stored as (in, out))
# ----------------------------------------------------------------------------
def init_params(key, dim, sr_ratio, qkv_bias=False):
    ks = jax.random.split(key, 8)
    std = 0.02

    def w(k, shape):
        return jax.random.normal(k, shape, jnp.float32) * std

    params = {
        "q_w": w(ks[0], (dim, dim)),
        "kv_w": w(ks[1], (dim, 2 * dim)),
        "proj_w": w(ks[2], (dim, dim)),
        "proj_b": w(ks[3], (dim,)),
    }
    # qkv_bias=False in the module -> q/kv biases do not exist (skipped in kernel)
    if sr_ratio > 1:
        # Conv2d(dim, dim, k=sr, stride=sr) weight OIHW, folded to (sr*sr*C, C)
        # matching the (ki, kj, C_in) patch flattening order.
        conv_oihw = w(ks[4], (dim, dim, sr_ratio, sr_ratio))
        params["sr_w"] = conv_oihw.transpose(2, 3, 1, 0).reshape(
            sr_ratio * sr_ratio * dim, dim)
        params["sr_b"] = w(ks[5], (dim,))
        params["ln_g"] = jnp.ones((dim,), jnp.float32)
        params["ln_b"] = jnp.zeros((dim,), jnp.float32)
    return params


def _run_case(key, *, B, dim, num_heads, sr_ratio,
              search_H, search_W, template_H, template_W, tol=1e-2):
    N = search_H * search_W + template_H * template_W
    kx, kp = jax.random.split(key)
    x = jax.random.normal(kx, (B, N, dim), jnp.float32)
    params = init_params(kp, dim, sr_ratio)

    out = attention_forward(
        x, params,
        num_heads=num_heads, sr_ratio=sr_ratio,
        search_H=search_H, search_W=search_W,
        template_H=template_H, template_W=template_W)
    jax.block_until_ready(out)
    assert out.shape == (B, N, dim)
    assert bool(jnp.all(jnp.isfinite(out)))

    ref = attention_reference(
        x, params,
        num_heads=num_heads, sr_ratio=sr_ratio,
        search_H=search_H, search_W=search_W,
        template_H=template_H, template_W=template_W)
    max_err = float(jnp.max(jnp.abs(out.astype(jnp.float32) - ref)))
    assert max_err < tol, f"sr_ratio={sr_ratio}: max abs error {max_err}"


if __name__ == "__main__":
    key = jax.random.PRNGKey(0)
    k1, k2 = jax.random.split(key)

    # sr_ratio > 1 path: strided conv reduction + LayerNorm + attention.
    _run_case(k1, B=2, dim=32, num_heads=4, sr_ratio=2,
              search_H=8, search_W=8, template_H=4, template_W=4)

    # sr_ratio == 1 path: plain multi-head self-attention.
    _run_case(k2, B=2, dim=32, num_heads=4, sr_ratio=1,
              search_H=4, search_W=4, template_H=2, template_W=2)

    print("KERNEL_OK")
</pallas_src>

<mosaic_0001>
module attributes {stable_mosaic.version = 11 : i64} {
  func.func @_fused_attention_kernel(%arg0: i32, %arg1: memref<1x80x32xbf16, #tpu.memory_space<vmem>>, %arg2: memref<1x20x128xbf16, #tpu.memory_space<vmem>>, %arg3: memref<32x32xbf16, #tpu.memory_space<vmem>>, %arg4: memref<32x64xbf16, #tpu.memory_space<vmem>>, %arg5: memref<128x32xbf16, #tpu.memory_space<vmem>>, %arg6: memref<1x32xf32, #tpu.memory_space<vmem>>, %arg7: memref<1x32xf32, #tpu.memory_space<vmem>>, %arg8: memref<1x32xf32, #tpu.memory_space<vmem>>, %arg9: memref<32x32xbf16, #tpu.memory_space<vmem>>, %arg10: memref<1x32xf32, #tpu.memory_space<vmem>>, %arg11: memref<1x80x32xf32, #tpu.memory_space<vmem>>) attributes {dimension_semantics = [#tpu.dimension_semantics<parallel>], iteration_bounds = array<i64: 2>, scalar_prefetch = 0 : i64, scratch_operands = 0 : i64, tpu.core_type = #tpu.core_type<tc>, window_params = [{transform_indices = @transform_0, window_bounds = array<i64: 1, 80, 32>}, {transform_indices = @transform_1, window_bounds = array<i64: 1, 20, 128>}, {pipeline_mode = #tpu.pipeline_mode<synchronous>, transform_indices = @transform_2, window_bounds = array<i64: 32, 32>}, {pipeline_mode = #tpu.pipeline_mode<synchronous>, transform_indices = @transform_3, window_bounds = array<i64: 32, 64>}, {pipeline_mode = #tpu.pipeline_mode<synchronous>, transform_indices = @transform_4, window_bounds = array<i64: 128, 32>}, {pipeline_mode = #tpu.pipeline_mode<synchronous>, transform_indices = @transform_5, window_bounds = array<i64: 1, 32>}, {pipeline_mode = #tpu.pipeline_mode<synchronous>, transform_indices = @transform_6, window_bounds = array<i64: 1, 32>}, {pipeline_mode = #tpu.pipeline_mode<synchronous>, transform_indices = @transform_7, window_bounds = array<i64: 1, 32>}, {pipeline_mode = #tpu.pipeline_mode<synchronous>, transform_indices = @transform_8, window_bounds = array<i64: 32, 32>}, {pipeline_mode = #tpu.pipeline_mode<synchronous>, transform_indices = @transform_9, window_bounds = array<i64: 1, 32>}, {transform_indices = @transform_10, window_bounds = array<i64: 1, 80, 32>}]} {
    %c0 = arith.constant 0 : index
    %c0_0 = arith.constant 0 : index
    %c0_1 = arith.constant 0 : index
    %0 = vector.load %arg1[%c0, %c0_0, %c0_1] : memref<1x80x32xbf16, #tpu.memory_space<vmem>>, vector<1x80x32xbf16>
    %1 = vector.shape_cast %0 : vector<1x80x32xbf16> to vector<80x32xbf16>
    %c0_2 = arith.constant 0 : index
    %c0_3 = arith.constant 0 : index
    %2 = vector.load %arg3[%c0_2, %c0_3] : memref<32x32xbf16, #tpu.memory_space<vmem>>, vector<32x32xbf16>
    %cst = arith.constant dense<0.000000e+00> : vector<80x32xf32>
    %3 = tpu.matmul %1, %2, %cst {dimension_numbers = #tpu.dot_dimension_numbers<[1], [0], [0], [1], [0, 0, 1, 1], [], []>} : vector<80x32xbf16>, vector<32x32xbf16>, vector<80x32xf32> -> vector<80x32xf32>
    %cst_4 = arith.constant 0.353553385 : f32
    %4 = vector.broadcast %cst_4 : f32 to vector<80x32xf32>
    %5 = arith.mulf %3, %4 : vector<80x32xf32>
    %c0_5 = arith.constant 0 : index
    %c0_6 = arith.constant 0 : index
    %c0_7 = arith.constant 0 : index
    %6 = vector.load %arg2[%c0_5, %c0_6, %c0_7] : memref<1x20x128xbf16, #tpu.memory_space<vmem>>, vector<1x20x128xbf16>
    %7 = vector.shape_cast %6 : vector<1x20x128xbf16> to vector<20x128xbf16>
    %c0_8 = arith.constant 0 : index
    %c0_9 = arith.constant 0 : index
    %8 = vector.load %arg5[%c0_8, %c0_9] : memref<128x32xbf16, #tpu.memory_space<vmem>>, vector<128x32xbf16>
    %cst_10 = arith.constant dense<0.000000e+00> : vector<20x32xf32>
    %9 = tpu.matmul %7, %8, %cst_10 {dimension_numbers = #tpu.dot_dimension_numbers<[1], [0], [0], [1], [0, 0, 1, 1], [], []>} : vector<20x128xbf16>, vector<128x32xbf16>, vector<20x32xf32> -> vector<20x32xf32>
    %c0_11 = arith.constant 0 : index
    %c0_12 = arith.constant 0 : index
    %10 = vector.load %arg6[%c0_11, %c0_12] : memref<1x32xf32, #tpu.memory_space<vmem>>, vector<1x32xf32>
    %11 = vector.broadcast %10 : vector<1x32xf32> to vector<20x32xf32>
    %12 = arith.addf %9, %11 : vector<20x32xf32>
    %cst_13 = arith.constant dense<0.000000e+00> : vector<20xf32>
    %13 = vector.multi_reduction <add>, %12, %cst_13 [1] : vector<20x32xf32> to vector<20xf32>
    %14 = vector.shape_cast %13 : vector<20xf32> to vector<20x1xf32>
    %cst_14 = arith.constant 3.200000e+01 : f32
    %15 = vector.broadcast %cst_14 : f32 to vector<20x1xf32>
    %16 = arith.divf %14, %15 : vector<20x1xf32>
    %17 = vector.broadcast %16 : vector<20x1xf32> to vector<20x32xf32>
    %18 = arith.subf %12, %17 : vector<20x32xf32>
    %19 = arith.mulf %18, %18 : vector<20x32xf32>
    %cst_15 = arith.constant dense<0.000000e+00> : vector<20xf32>
    %20 = vector.multi_reduction <add>, %19, %cst_15 [1] : vector<20x32xf32> to vector<20xf32>
    %21 = vector.shape_cast %20 : vector<20xf32> to vector<20x1xf32>
    %cst_16 = arith.constant 3.200000e+01 : f32
    %22 = vector.broadcast %cst_16 : f32 to vector<20x1xf32>
    %23 = arith.divf %21, %22 : vector<20x1xf32>
    %24 = vector.broadcast %16 : vector<20x1xf32> to vector<20x32xf32>
    %25 = arith.subf %12, %24 : vector<20x32xf32>
    %cst_17 = arith.constant 9.99999974E-6 : f32
    %26 = vector.broadcast %cst_17 : f32 to vector<20x1xf32>
    %27 = arith.addf %23, %26 : vector<20x1xf32>
    %28 = math.rsqrt %27 : vector<20x1xf32>
    %29 = vector.broadcast %28 : vector<20x1xf32> to vector<20x32xf32>
    %30 = arith.mulf %25, %29 : vector<20x32xf32>
    %c0_18 = arith.constant 0 : index
    %c0_19 = arith.constant 0 : index
    %31 = vector.load %arg7[%c0_18, %c0_19] : memref<1x32xf32, #tpu.memory_space<vmem>>, vector<1x32xf32>
    %32 = vector.broadcast %31 : vector<1x32xf32> to vector<20x32xf32>
    %33 = arith.mulf %30, %32 : vector<20x32xf32>
    %c0_20 = arith.constant 0 : index
    %c0_21 = arith.constant 0 : index
    %34 = vector.load %arg8[%c0_20, %c0_21] : memref<1x32xf32, #tpu.memory_space<vmem>>, vector<1x32xf32>
    %35 = vector.broadcast %34 : vector<1x32xf32> to vector<20x32xf32>
    %36 = arith.addf %33, %35 : vector<20x32xf32>
    %37 = arith.truncf %36 : vector<20x32xf32> to vector<20x32xbf16>
    %c0_22 = arith.constant 0 : index
    %c0_23 = arith.constant 0 : index
    %38 = vector.load %arg4[%c0_22, %c0_23] : memref<32x64xbf16, #tpu.memory_space<vmem>>, vector<32x64xbf16>
    %cst_24 = arith.constant dense<0.000000e+00> : vector<20x64xf32>
    %39 = tpu.matmul %37, %38, %cst_24 {dimension_numbers = #tpu.dot_dimension_numbers<[1], [0], [0], [1], [0, 0, 1, 1], [], []>} : vector<20x32xbf16>, vector<32x64xbf16>, vector<20x64xf32> -> vector<20x64xf32>
    %40 = vector.extract_strided_slice %39 {offsets = [0, 0], sizes = [20, 32], strides = [1, 1]} : vector<20x64xf32> to vector<20x32xf32>
    %41 = vector.extract_strided_slice %39 {offsets = [0, 32], sizes = [20, 32], strides = [1, 1]} : vector<20x64xf32> to vector<20x32xf32>
    %42 = arith.truncf %41 : vector<20x32xf32> to vector<20x32xbf16>
    %43 = vector.extract_strided_slice %5 {offsets = [0, 0], sizes = [80, 8], strides = [1, 1]} : vector<80x32xf32> to vector<80x8xf32>
    %44 = arith.truncf %43 : vector<80x8xf32> to vector<80x8xbf16>
    %45 = vector.extract_strided_slice %40 {offsets = [0, 0], sizes = [20, 8], strides = [1, 1]} : vector<20x32xf32> to vector<20x8xf32>
    %46 = arith.truncf %45 : vector<20x8xf32> to vector<20x8xbf16>
    %cst_25 = arith.constant dense<0.000000e+00> : vector<80x20xf32>
    %47 = tpu.matmul %44, %46, %cst_25 {dimension_numbers = #tpu.dot_dimension_numbers<[1], [1], [0], [0], [0, 0, 1, 0], [], []>} : vector<80x8xbf16>, vector<20x8xbf16>, vector<80x20xf32> -> vector<80x20xf32>
    %cst_26 = arith.constant dense<0xFF800000> : vector<80xf32>
    %48 = vector.multi_reduction <maximumf>, %47, %cst_26 [1] : vector<80x20xf32> to vector<80xf32>
    %49 = vector.shape_cast %48 : vector<80xf32> to vector<80x1xf32>
    %50 = vector.broadcast %49 : vector<80x1xf32> to vector<80x20xf32>
    %51 = arith.subf %47, %50 : vector<80x20xf32>
    %52 = math.exp %51 : vector<80x20xf32>
    %cst_27 = arith.constant dense<0.000000e+00> : vector<80xf32>
    %53 = vector.multi_reduction <add>, %52, %cst_27 [1] : vector<80x20xf32> to vector<80xf32>
    %54 = vector.shape_cast %53 : vector<80xf32> to vector<80x1xf32>
    %55 = tpu.reciprocal %54 {approx = true} : vector<80x1xf32> -> vector<80x1xf32>
    %56 = vector.broadcast %55 : vector<80x1xf32> to vector<80x20xf32>
    %57 = arith.mulf %52, %56 : vector<80x20xf32>
    %58 = arith.truncf %57 : vector<80x20xf32> to vector<80x20xbf16>
    %59 = vector.extract_strided_slice %42 {offsets = [0, 0], sizes = [20, 8], strides = [1, 1]} : vector<20x32xbf16> to vector<20x8xbf16>
    %cst_28 = arith.constant dense<0.000000e+00> : vector<80x8xf32>
    %60 = tpu.matmul %58, %59, %cst_28 {dimension_numbers = #tpu.dot_dimension_numbers<[1], [0], [0], [1], [0, 0, 1, 1], [], []>} : vector<80x20xbf16>, vector<20x8xbf16>, vector<80x8xf32> -> vector<80x8xf32>
    %61 = arith.truncf %60 : vector<80x8xf32> to vector<80x8xbf16>
    %62 = vector.extract_strided_slice %5 {offsets = [0, 8], sizes = [80, 8], strides = [1, 1]} : vector<80x32xf32> to vector<80x8xf32>
    %63 = arith.truncf %62 : vector<80x8xf32> to vector<80x8xbf16>
    %64 = vector.extract_strided_slice %40 {offsets = [0, 8], sizes = [20, 8], strides = [1, 1]} : vector<20x32xf32> to vector<20x8xf32>
    %65 = arith.truncf %64 : vector<20x8xf32> to vector<20x8xbf16>
    %cst_29 = arith.constant dense<0.000000e+00> : vector<80x20xf32>
    %66 = tpu.matmul %63, %65, %cst_29 {dimension_numbers = #tpu.dot_dimension_numbers<[1], [1], [0], [0], [0, 0, 1, 0], [], []>} : vector<80x8xbf16>, vector<20x8xbf16>, vector<80x20xf32> -> vector<80x20xf32>
    %cst_30 = arith.constant dense<0xFF800000> : vector<80xf32>
    %67 = vector.multi_reduction <maximumf>, %66, %cst_30 [1] : vector<80x20xf32> to vector<80xf32>
    %68 = vector.shape_cast %67 : vector<80xf32> to vector<80x1xf32>
    %69 = vector.broadcast %68 : vector<80x1xf32> to vector<80x20xf32>
    %70 = arith.subf %66, %69 : vector<80x20xf32>
    %71 = math.exp %70 : vector<80x20xf32>
    %cst_31 = arith.constant dense<0.000000e+00> : vector<80xf32>
    %72 = vector.multi_reduction <add>, %71, %cst_31 [1] : vector<80x20xf32> to vector<80xf32>
    %73 = vector.shape_cast %72 : vector<80xf32> to vector<80x1xf32>
    %74 = tpu.reciprocal %73 {approx = true} : vector<80x1xf32> -> vector<80x1xf32>
    %75 = vector.broadcast %74 : vector<80x1xf32> to vector<80x20xf32>
    %76 = arith.mulf %71, %75 : vector<80x20xf32>
    %77 = arith.truncf %76 : vector<80x20xf32> to vector<80x20xbf16>
    %78 = vector.extract_strided_slice %42 {offsets = [0, 8], sizes = [20, 8], strides = [1, 1]} : vector<20x32xbf16> to vector<20x8xbf16>
    %cst_32 = arith.constant dense<0.000000e+00> : vector<80x8xf32>
    %79 = tpu.matmul %77, %78, %cst_32 {dimension_numbers = #tpu.dot_dimension_numbers<[1], [0], [0], [1], [0, 0, 1, 1], [], []>} : vector<80x20xbf16>, vector<20x8xbf16>, vector<80x8xf32> -> vector<80x8xf32>
    %80 = arith.truncf %79 : vector<80x8xf32> to vector<80x8xbf16>
    %81 = vector.extract_strided_slice %5 {offsets = [0, 16], sizes = [80, 8], strides = [1, 1]} : vector<80x32xf32> to vector<80x8xf32>
    %82 = arith.truncf %81 : vector<80x8xf32> to vector<80x8xbf16>
    %83 = vector.extract_strided_slice %40 {offsets = [0, 16], sizes = [20, 8], strides = [1, 1]} : vector<20x32xf32> to vector<20x8xf32>
    %84 = arith.truncf %83 : vector<20x8xf32> to vector<20x8xbf16>
    %cst_33 = arith.constant dense<0.000000e+00> : vector<80x20xf32>
    %85 = tpu.matmul %82, %84, %cst_33 {dimension_numbers = #tpu.dot_dimension_numbers<[1], [1], [0], [0], [0, 0, 1, 0], [], []>} : vector<80x8xbf16>, vector<20x8xbf16>, vector<80x20xf32> -> vector<80x20xf32>
    %cst_34 = arith.constant dense<0xFF800000> : vector<80xf32>
    %86 = vector.multi_reduction <maximumf>, %85, %cst_34 [1] : vector<80x20xf32> to vector<80xf32>
    %87 = vector.shape_cast %86 : vector<80xf32> to vector<80x1xf32>
    %88 = vector.broadcast %87 : vector<80x1xf32> to vector<80x20xf32>
    %89 = arith.subf %85, %88 : vector<80x20xf32>
    %90 = math.exp %89 : vector<80x20xf32>
    %cst_35 = arith.constant dense<0.000000e+00> : vector<80xf32>
    %91 = vector.multi_reduction <add>, %90, %cst_35 [1] : vector<80x20xf32> to vector<80xf32>
    %92 = vector.shape_cast %91 : vector<80xf32> to vector<80x1xf32>
    %93 = tpu.reciprocal %92 {approx = true} : vector<80x1xf32> -> vector<80x1xf32>
    %94 = vector.broadcast %93 : vector<80x1xf32> to vector<80x20xf32>
    %95 = arith.mulf %90, %94 : vector<80x20xf32>
    %96 = arith.truncf %95 : vector<80x20xf32> to vector<80x20xbf16>
    %97 = vector.extract_strided_slice %42 {offsets = [0, 16], sizes = [20, 8], strides = [1, 1]} : vector<20x32xbf16> to vector<20x8xbf16>
    %cst_36 = arith.constant dense<0.000000e+00> : vector<80x8xf32>
    %98 = tpu.matmul %96, %97, %cst_36 {dimension_numbers = #tpu.dot_dimension_numbers<[1], [0], [0], [1], [0, 0, 1, 1], [], []>} : vector<80x20xbf16>, vector<20x8xbf16>, vector<80x8xf32> -> vector<80x8xf32>
    %99 = arith.truncf %98 : vector<80x8xf32> to vector<80x8xbf16>
    %100 = vector.extract_strided_slice %5 {offsets = [0, 24], sizes = [80, 8], strides = [1, 1]} : vector<80x32xf32> to vector<80x8xf32>
    %101 = arith.truncf %100 : vector<80x8xf32> to vector<80x8xbf16>
    %102 = vector.extract_strided_slice %40 {offsets = [0, 24], sizes = [20, 8], strides = [1, 1]} : vector<20x32xf32> to vector<20x8xf32>
    %103 = arith.truncf %102 : vector<20x8xf32> to vector<20x8xbf16>
    %cst_37 = arith.constant dense<0.000000e+00> : vector<80x20xf32>
    %104 = tpu.matmul %101, %103, %cst_37 {dimension_numbers = #tpu.dot_dimension_numbers<[1], [1], [0], [0], [0, 0, 1, 0], [], []>} : vector<80x8xbf16>, vector<20x8xbf16>, vector<80x20xf32> -> vector<80x20xf32>
    %cst_38 = arith.constant dense<0xFF800000> : vector<80xf32>
    %105 = vector.multi_reduction <maximumf>, %104, %cst_38 [1] : vector<80x20xf32> to vector<80xf32>
    %106 = vector.shape_cast %105 : vector<80xf32> to vector<80x1xf32>
    %107 = vector.broadcast %106 : vector<80x1xf32> to vector<80x20xf32>
    %108 = arith.subf %104, %107 : vector<80x20xf32>
    %109 = math.exp %108 : vector<80x20xf32>
    %cst_39 = arith.constant dense<0.000000e+00> : vector<80xf32>
    %110 = vector.multi_reduction <add>, %109, %cst_39 [1] : vector<80x20xf32> to vector<80xf32>
    %111 = vector.shape_cast %110 : vector<80xf32> to vector<80x1xf32>
    %112 = tpu.reciprocal %111 {approx = true} : vector<80x1xf32> -> vector<80x1xf32>
    %113 = vector.broadcast %112 : vector<80x1xf32> to vector<80x20xf32>
    %114 = arith.mulf %109, %113 : vector<80x20xf32>
    %115 = arith.truncf %114 : vector<80x20xf32> to vector<80x20xbf16>
    %116 = vector.extract_strided_slice %42 {offsets = [0, 24], sizes = [20, 8], strides = [1, 1]} : vector<20x32xbf16> to vector<20x8xbf16>
    %cst_40 = arith.constant dense<0.000000e+00> : vector<80x8xf32>
    %117 = tpu.matmul %115, %116, %cst_40 {dimension_numbers = #tpu.dot_dimension_numbers<[1], [0], [0], [1], [0, 0, 1, 1], [], []>} : vector<80x20xbf16>, vector<20x8xbf16>, vector<80x8xf32> -> vector<80x8xf32>
    %118 = arith.truncf %117 : vector<80x8xf32> to vector<80x8xbf16>
    %119 = tpu.concatenate %61, %80, %99, %118 in 1 : vector<80x8xbf16>, vector<80x8xbf16>, vector<80x8xbf16>, vector<80x8xbf16> -> vector<80x32xbf16>
    %c0_41 = arith.constant 0 : index
    %c0_42 = arith.constant 0 : index
    %120 = vector.load %arg9[%c0_41, %c0_42] : memref<32x32xbf16, #tpu.memory_space<vmem>>, vector<32x32xbf16>
    %cst_43 = arith.constant dense<0.000000e+00> : vector<80x32xf32>
    %121 = tpu.matmul %119, %120, %cst_43 {dimension_numbers = #tpu.dot_dimension_numbers<[1], [0], [0], [1], [0, 0, 1, 1], [], []>} : vector<80x32xbf16>, vector<32x32xbf16>, vector<80x32xf32> -> vector<80x32xf32>
    %c0_44 = arith.constant 0 : index
    %c0_45 = arith.constant 0 : index
    %122 = vector.load %arg10[%c0_44, %c0_45] : memref<1x32xf32, #tpu.memory_space<vmem>>, vector<1x32xf32>
    %123 = vector.broadcast %122 : vector<1x32xf32> to vector<80x32xf32>
    %124 = arith.addf %121, %123 : vector<80x32xf32>
    %c0_46 = arith.constant 0 : index
    %c0_47 = arith.constant 0 : index
    %c0_48 = arith.constant 0 : index
    %125 = vector.load %arg11[%c0_46, %c0_47, %c0_48] : memref<1x80x32xf32, #tpu.memory_space<vmem>>, vector<1x80x32xf32>
    %126 = vector.shape_cast %125 : vector<1x80x32xf32> to vector<80x32xf32>
    %127 = vector.shape_cast %124 : vector<80x32xf32> to vector<1x80x32xf32>
    tpu.vector_store %arg11[%c0_46, %c0_47, %c0_48], %127 {strides = array<i32>} : memref<1x80x32xf32, #tpu.memory_space<vmem>>, vector<1x80x32xf32>,
    return
  }
  func.func @transform_0(%arg0: i32) -> (i32, i32, i32) {
    %c0_i32 = arith.constant 0 : i32
    %c0_i32_0 = arith.constant 0 : i32
    %c0_i32_1 = arith.constant 0 : i32
    return %arg0, %c0_i32, %c0_i32_0 : i32, i32, i32
  }
  func.func @transform_1(%arg0: i32) -> (i32, i32, i32) {
    %c0_i32 = arith.constant 0 : i32
    %c0_i32_0 = arith.constant 0 : i32
    %c0_i32_1 = arith.constant 0 : i32
    return %arg0, %c0_i32, %c0_i32_0 : i32, i32, i32
  }
  func.func @transform_2(%arg0: i32) -> (i32, i32) {
    %c0_i32 = arith.constant 0 : i32
    %c0_i32_0 = arith.constant 0 : i32
    %c0_i32_1 = arith.constant 0 : i32
    return %c0_i32, %c0_i32_0 : i32, i32
  }
  func.func @transform_3(%arg0: i32) -> (i32, i32) {
    %c0_i32 = arith.constant 0 : i32
    %c0_i32_0 = arith.constant 0 : i32
    %c0_i32_1 = arith.constant 0 : i32
    return %c0_i32, %c0_i32_0 : i32, i32
  }
  func.func @transform_4(%arg0: i32) -> (i32, i32) {
    %c0_i32 = arith.constant 0 : i32
    %c0_i32_0 = arith.constant 0 : i32
    %c0_i32_1 = arith.constant 0 : i32
    return %c0_i32, %c0_i32_0 : i32, i32
  }
  func.func @transform_5(%arg0: i32) -> (i32, i32) {
    %c0_i32 = arith.constant 0 : i32
    %c0_i32_0 = arith.constant 0 : i32
    %c0_i32_1 = arith.constant 0 : i32
    return %c0_i32, %c0_i32_0 : i32, i32
  }
  func.func @transform_6(%arg0: i32) -> (i32, i32) {
    %c0_i32 = arith.constant 0 : i32
    %c0_i32_0 = arith.constant 0 : i32
    %c0_i32_1 = arith.constant 0 : i32
    return %c0_i32, %c0_i32_0 : i32, i32
  }
  func.func @transform_7(%arg0: i32) -> (i32, i32) {
    %c0_i32 = arith.constant 0 : i32
    %c0_i32_0 = arith.constant 0 : i32
    %c0_i32_1 = arith.constant 0 : i32
    return %c0_i32, %c0_i32_0 : i32, i32
  }
  func.func @transform_8(%arg0: i32) -> (i32, i32) {
    %c0_i32 = arith.constant 0 : i32
    %c0_i32_0 = arith.constant 0 : i32
    %c0_i32_1 = arith.constant 0 : i32
    return %c0_i32, %c0_i32_0 : i32, i32
  }
  func.func @transform_9(%arg0: i32) -> (i32, i32) {
    %c0_i32 = arith.constant 0 : i32
    %c0_i32_0 = arith.constant 0 : i32
    %c0_i32_1 = arith.constant 0 : i32
    return %c0_i32, %c0_i32_0 : i32, i32
  }
  func.func @transform_10(%arg0: i32) -> (i32, i32, i32) {
    %c0_i32 = arith.constant 0 : i32
    %c0_i32_0 = arith.constant 0 : i32
    %c0_i32_1 = arith.constant 0 : i32
    return %arg0, %c0_i32, %c0_i32_0 : i32, i32, i32
  }
}

</mosaic_0001>

<bundles_post_ra>
// kernel: tpu_custom_call.1
= control target key start
LH: loop header
LB: loop body
LE: loop exit
PB: predicated region body
PF: predicated region fallthrough
CT: control target
= control target key end

     0   :  { %s3084_s13 = smov 0   ;;  %s3934_s0 = inlined_call_operand.vmem [shape: bf16[2,80,32], index: 0, kind: input, shape index: {}]   ;;  %s3935_s1 = inlined_call_operand.vmem [shape: bf16[2,20,128], index: 1, kind: input, shape index: {}]   ;;  %s3936_s2 = inlined_call_operand.vmem [shape: bf16[32,32], index: 2, kind: input, shape index: {}]   ;;  %s3937_s3 = inlined_call_operand.vmem [shape: bf16[32,64], index: 3, kind: input, shape index: {}]   ;;  %s3938_s4 = inlined_call_operand.vmem [shape: bf16[128,32], index: 4, kind: input, shape index: {}]   ;;  %s3939_s5 = inlined_call_operand.vmem [shape: f32[1,32], index: 5, kind: input, shape index: {}]   ;;  %s3940_s6 = inlined_call_operand.vmem [shape: f32[1,32], index: 6, kind: input, shape index: {}]   ;;  %s3941_s7 = inlined_call_operand.vmem [shape: f32[1,32], index: 7, kind: input, shape index: {}]   ;;  %s3942_s8 = inlined_call_operand.vmem [shape: bf16[32,32], index: 8, kind: input, shape index: {}]   ;;  %s3943_s9 = inlined_call_operand.vmem [shape: f32[1,32], index: 9, kind: input, shape index: {}]   ;;  %s3944_s10 = inlined_call_operand.vmem [shape: f32[2,80,32], index: 10, kind: output, shape index: {}]  }
   0x1 LB: > { %s2360_s14 = sadd.s32 4294967295, %s3015_s13   ;;  %p2364_p0 = scmp.ge.s32.totalorder %s3015_s13, 1  ;;  %s3015_s13 = sphi %s3084_s13, %s20_s13  }
   0x2   : > { %p322_p1 = scmp.lt.s32.totalorder %s3015_s13, 3 }
   0x4   : > { %p323_p2 = pnand %p2364_p0, %p322_p1 }
   0x6   : > { %326 = sbr.rel (%p323_p2) target bundleno = 2125 (0x84d), region = 60 }
   0xb   : > { %v2822_v0 = vld [vmem:[%s3936_s2 + $0x8] sm:$0xff]   ;;  %v3945_v1 = vmov 0.0   ;;  %v2823_v2 = vld [vmem:[%s3936_s2] sm:$0xff]   ;;  %vm3018_vm0 = vmmov 0   ;;  %p365_p3 = scmp.lt.s32.totalorder %s2360_s14, 1  ;;  %v2825_v3 = vld [vmem:[%s3938_s4 + $0x38] sm:$0xff]  }
   0xc   : > { %2531 = vmatprep.subr.bf16.mxu1 %v3945_v1  ;;  %2583 = vmatprep.subr.bf16.mxu0 %v3945_v1  ;;  %vm432_vm1 = vcmask 261120   ;;  %v2826_v4 = vld [vmem:[%s3938_s4 + $0x30] sm:$0xff]   ;;  %v2828_v6 = vld [vmem:[%s3938_s4 + $0x28] sm:$0xff]   ;;  %v2829_v8 = vld [vmem:[%s3938_s4 + $0x20] sm:$0xff]   ;;  %vm669_vm2 = vcmask 257024   ;;  %vm803_vm3 = vcmask 64512  }
   0xd   : > { %2532 = vmatpush3.bf16.msra.mxu1 %v2822_v0  ;;  %2535 = vmatprep.mubr.msk.bf16.mxu1 %vm3018_vm0, %v3945_v1  ;;  %s3958_s14 = smov (!%p365_p3, %s2360_s14), 1  ;;  %v2831_v9 = vld [vmem:[%s3938_s4 + $0x18] sm:$0xff]   ;;  %v2833_v11 = vld [vmem:[%s3938_s4 + $0x10] sm:$0xff]   ;;  %v2834_v12 = vld [vmem:[%s3938_s4 + $0x8] sm:$0xff]   ;;  %s3019_s17 = smov 120   ;;  %vm1036_vm4 = vcmask 1041408  }
   0xe   : > { %2533 = vmatprep.subr.bf16.mxu1 %v3945_v1  ;;  %2587 = vmatprep.mubr.msk.bf16.mxu0 %vm3018_vm0, %v3945_v1  ;;  %s2799_s21 = smul.u32 40, %s3958_s14  ;;  %v2836_v14 = vld [vmem:[%s3938_s4] sm:$0xff]   ;;  %s3020_s18 = smov 112   ;;  %vm898_vm5 = vcmask 162816   ;;  %vm2155_vm6 = vcmask 130048   ;;  %vm2166_vm7 = vcmask 195584  }
   0xf   : > { %s2800_s27 = smul.u32 12, %s3958_s14  ;;  %v2380_v52 = vld [vmem:[%s3939_s5] ss:$0 sm:$0xff]  ;;  %s3021_s19 = smov 104  }
  0x10   : > { %s3114_s24 = scalar_lea.vmem %s3934_s0, %s2799_s21  ;;  %s3022_s20 = smov 88  }
  0x11   : > { %2534 = vmatpush3.bf16.msra.mxu1 %v2823_v2  ;;  %v2824_v5 = vld [vmem:[%s3114_s24] sm:$0xff]   ;;  %s3130_s12 = scalar_lea.vmem %s3935_s1, %s2800_s27  ;;  %v2827_v7 = vld [vmem:[%s3114_s24 + $0x8] sm:$0xff]   ;;  %v2830_v10 = vld [vmem:[%s3114_s24 + $0x10] sm:$0xff]   ;;  %s3023_s21 = smov 96  }
  0x12   : > { %2555 = vmatprep.subr.bf16.mxu1 %v2825_v3  ;;  %v2832_v13 = vld [vmem:[%s3114_s24 + $0x18] sm:$0xff]   ;;  %v2835_v15 = vld [vmem:[%s3114_s24 + $0x20] sm:$0xff]   ;;  %v2838_v17 = vld [vmem:[%s3130_s12 + $0x8] ss:$0 sps:$4 sm:$0x33]   ;;  %s3024_s22 = smov 80  }
  0x13   : > { %v2837_v16 = vld [vmem:[%s3130_s12] sm:$0xff]   ;;  %s3025_s23 = smov 72   ;;  %s3026_s25 = smov 8  }
  0x14   : > { %2536 = vmatmul.mubr.msk.bf16.vlgmr.msra.gmra.mxu1 %vm432_vm1, %v2824_v5  ;;  %s3027_s27 = smov 16   ;;  %s3028_s30 = smov 24  }
  0x15   : > { %2556 = vmatpush3.bf16.msra.mxu1 %v2825_v3  ;;  %2539 = vmatprep.mubr.msk.bf16.mxu1 %vm3018_vm0, %v3945_v1  ;;  %s2801_s11 = smul.u32 80, %s3958_s14 }
  0x16   : > { %2557 = vmatprep.subr.bf16.mxu1 %v2826_v4 }
  0x19   : > { %2558 = vmatpush3.bf16.msra.mxu1 %v2826_v4 }
  0x1a   : > { %2559 = vmatprep.subr.bf16.mxu1 %v2828_v6 }
  0x1c   : > { %2540 = vmatmul.mubr.msk.bf16.gmra.mxu1 %vm432_vm1, %v2827_v7 }
  0x1d   : > { %2560 = vmatpush3.bf16.msra.mxu1 %v2828_v6  ;;  %2543 = vmatprep.mubr.msk.bf16.mxu1 %vm3018_vm0, %v3945_v1 }
  0x1e   : > { %2561 = vmatprep.subr.bf16.mxu1 %v2829_v8 }
  0x21   : > { %2562 = vmatpush3.bf16.msra.mxu1 %v2829_v8 }
  0x22   : > { %2563 = vmatprep.subr.bf16.mxu1 %v2831_v9 }
  0x24   : > { %2544 = vmatmul.mubr.msk.bf16.gmra.mxu1 %vm432_vm1, %v2830_v10 }
  0x25   : > { %2564 = vmatpush3.bf16.msra.mxu1 %v2831_v9  ;;  %2547 = vmatprep.mubr.msk.bf16.mxu1 %vm3018_vm0, %v3945_v1 }
  0x26   : > { %2565 = vmatprep.subr.bf16.mxu1 %v2833_v11 }
  0x29   : > { %2566 = vmatpush3.bf16.msra.mxu1 %v2833_v11 }
  0x2a   : > { %2567 = vmatprep.subr.bf16.mxu1 %v2834_v12 }
  0x2c   : > { %2548 = vmatmul.mubr.msk.bf16.gmra.mxu1 %vm432_vm1, %v2832_v13 }
  0x2d   : > { %2551 = vmatprep.mubr.msk.bf16.mxu1 %vm3018_vm0, %v3945_v1  ;;  %2568 = vmatpush3.bf16.msra.mxu1 %v2834_v12 }
  0x2e   : > { %2569 = vmatprep.subr.bf16.mxu1 %v2836_v14 }
  0x31   : > { %2570 = vmatpush3.bf16.msra.mxu1 %v2836_v14 }
  0x34   : > { %2552 = vmatmul.mubr.msk.bf16.gmra.mxu1 %vm432_vm1, %v2835_v15 }
  0x35   : > { %2571 = vmatprep.mubr.bf16.mxu1 %v2837_v16  ;;  %v2839_v16 = vld [vmem:[%s3937_s3 + $0x8] sm:$0xff]  }
  0x36   : > { %2575 = vmatprep.subr.bf16.mxu1 %v2839_v16 }
  0x3c   : > { %2572 = vmatmul.mubr.bf16.vlgmr.msra.gmra.mxu1 %v2838_v17  ;;  %v2840_v17 = vld [vmem:[%s3937_s3] sm:$0xff]  }
  0x3d   : > { %2576 = vmatpush3.bf16.msra.mxu1 %v2839_v16 }
  0x3e   : > { %2577 = vmatprep.subr.bf16.mxu1 %v2840_v17 }
  0x41   : > { %2578 = vmatpush3.bf16.msra.mxu1 %v2840_v17 }
  0x42   : > { %2607 = vmatprep.subr.bf16.mxu1 %v3945_v1 }
  0xd4   : > { %v482_v18 = vpop.f32.mrf.mxu1 }
  0xd5   : > { %v521_v21 = vmul.f32 0.35355338, %v482_v18 }
  0xd6   : > { %v2537_v19 = vpop.f32.mrf.mxu1 }
  0xd8   : > { %v485_v20 = vpop.f32.mrf.mxu1 }
  0xd9   : > { %v522_v22 = vmul.f32 0.35355338, %v485_v20 }
  0xda   : > { %v2538_v23 = vpop.f32.mrf.mxu1 }
  0xdb   : > { %v3163_v24 = vpack.c.bf16 %v522_v22, %v521_v21 }
  0xdc   : > { %v490_v25 = vpop.f32.mrf.mxu1 }
  0xdd   : > { %v523_v28 = vmul.f32 0.35355338, %v490_v25 }
  0xde   : > { %v2541_v26 = vpop.f32.mrf.mxu1 }
  0xe0   : > { %v493_v27 = vpop.f32.mrf.mxu1 }
  0xe1   : > { %v524_v29 = vmul.f32 0.35355338, %v493_v27 }
  0xe2   : > { %v2542_v30 = vpop.f32.mrf.mxu1 }
  0xe3   : > { %v3165_v31 = vpack.c.bf16 %v524_v29, %v523_v28  ;;  %v2391_v30 = vld [vmem:[%s3940_s6] ss:$0 sm:$0xff] }
  0xe4   : > { %v498_v32 = vpop.f32.mrf.mxu1 }
  0xe5   : > { %v525_v35 = vmul.f32 0.35355338, %v498_v32 }
  0xe6   : > { %v2545_v33 = vpop.f32.mrf.mxu1 }
  0xe8   : > { %v501_v34 = vpop.f32.mrf.mxu1 }
  0xe9   : > { %v526_v36 = vmul.f32 0.35355338, %v501_v34 }
  0xea   : > { %v2546_v37 = vpop.f32.mrf.mxu1 }
  0xeb   : > { %v3167_v38 = vpack.c.bf16 %v526_v36, %v525_v35  ;;  %v2392_v37 = vld [vmem:[%s3941_s7] ss:$0 sm:$0xff] }
  0xec   : > { %v506_v39 = vpop.f32.mrf.mxu1 }
  0xed   : > { %v527_v42 = vmul.f32 0.35355338, %v506_v39 }
  0xee   : > { %v2549_v40 = vpop.f32.mrf.mxu1 }
  0xf0   : > { %v509_v41 = vpop.f32.mrf.mxu1 }
  0xf1   : > { %v528_v43 = vmul.f32 0.35355338, %v509_v41 }
  0xf2   : > { %v2550_v44 = vpop.f32.mrf.mxu1 }
  0xf3   : > { %v3169_v45 = vpack.c.bf16 %v528_v43, %v527_v42 }
  0xf4   : > { %v514_v46 = vpop.f32.mrf.mxu1 }
  0xf5   : > { %v529_v49 = vmul.f32 0.35355338, %v514_v46 }
  0xf6   : > { %v2553_v47 = vpop.f32.mrf.mxu1 }
  0xf8   : > { %v517_v48 = vpop.f32.mrf.mxu1 }
  0xf9   : > { %v530_v50 = vmul.f32 0.35355338, %v517_v48 }
  0xfa   : > { %v2554_v51 = vpop.f32.mrf.mxu1 }
  0xfb   : > { %v3174_v53 = vpack.c.bf16 %v530_v50, %v529_v49 }
  0xfc   : > { %v2573_v54 = vpop.f32.mrf.mxu1 }
  0xfd   : > { %v658_v55 = vadd.f32 %v2573_v54, %v2380_v52 }
  0xfe   : > { %v649_v56 = vpop.f32.mrf.mxu1 }
  0xff   : > { %v650_v57 = vadd.f32 %v2380_v52, %v649_v56  ;;  %v670_v58 = vsel %vm669_vm2, %v658_v55, 0.0 }
 0x100   : > { %671 = vadd.xlane.f32.xlu1 %v670_v58  ;;  %v2574_v59 = vpop.f32.mrf.mxu1 }
 0x101   : > { %v663_v60 = vsel %vm432_vm1, %v650_v57, 0.0 }
 0x102   : > { %v652_v61 = vpop.f32.mrf.mxu1  ;;  %664 = vadd.xlane.f32.xlu0 %v663_v60 }
 0x103   : > { %v653_v62 = vadd.f32 %v2380_v52, %v652_v61 }
 0x105   : > { %v666_v63 = vsel %vm432_vm1, %v653_v62, 0.0 }
 0x106   : > { %667 = vadd.xlane.f32.xlu0 %v666_v63 }
 0x189   : > { %v672_v0 = vpop.xlane.xlu1 %671 }
 0x18a   : > { %v676_v2 = vmul.f32 0.03125, %v672_v0 }
 0x18b   : > { %v665_v3 = vpop.xlane.xlu0 %664 }
 0x18c   : > { %v674_v4 = vmul.f32 0.03125, %v665_v3  ;;  %v679_v5 = vsub.f32 %v658_v55, %v676_v2 }
 0x18e   : > { %v677_v6 = vsub.f32 %v650_v57, %v674_v4  ;;  %v682_v12 = vmul.f32 %v679_v5, %v679_v5 }
 0x18f   : > { %v668_v7 = vpop.xlane.xlu0 %667 }
 0x190   : > { %v675_v8 = vmul.f32 0.03125, %v668_v7  ;;  %v680_v9 = vmul.f32 %v677_v6, %v677_v6  ;;  %v689_v14 = vsel %vm669_vm2, %v682_v12, 0.0 }
 0x192   : > { %v678_v10 = vsub.f32 %v653_v62, %v675_v8  ;;  %v683_v11 = vsel %vm432_vm1, %v680_v9, 0.0 }
 0x193   : > { %684 = vadd.xlane.f32.xlu1 %v683_v11 }
 0x194   : > { %v681_v13 = vmul.f32 %v678_v10, %v678_v10 }
 0x196   : > { %v686_v15 = vsel %vm432_vm1, %v681_v13, 0.0 }
 0x197   : > { %690 = vadd.xlane.f32.xlu1 %v689_v14  ;;  %687 = vadd.xlane.f32.xlu0 %v686_v15 }
 0x21c   : > { %v685_v18 = vpop.xlane.xlu1 %684 }
 0x21d   : > { %v692_v19 = vmul.f32 0.03125, %v685_v18 }
 0x21f   : > { %v695_v20 = vadd.f32 1e-05, %v692_v19 }
 0x220   : > { %v691_v21 = vpop.xlane.xlu1 %690  ;;  %v688_v22 = vpop.xlane.xlu0 %687 }
 0x221   : > { %2843 = vrsqrt.f32 %v695_v20  ;;  %v694_v23 = vmul.f32 0.03125, %v691_v21  ;;  %v693_v25 = vmul.f32 0.03125, %v688_v22 }
 0x223   : > { %v697_v26 = vadd.f32 1e-05, %v694_v23  ;;  %v696_v27 = vadd.f32 1e-05, %v693_v25 }
 0x225   : > { %2845 = vrsqrt.f32 %v697_v26 }
 0x226   : > { %2847 = vrsqrt.f32 %v696_v27 }
 0x22e   : > { %v2844_v28 = vpop.eup %2843 }
 0x22f   : > { %v701_v29 = vmul.f32 %v2844_v28, %v677_v6 }
 0x231   : > { %v711_v36 = vmul.f32 %v2391_v30, %v701_v29 }
 0x232   : > { %v2846_v32 = vpop.eup %2845 }
 0x233   : > { %v2848_v33 = vpop.eup %2847  ;;  %v703_v34 = vmul.f32 %v2846_v32, %v679_v5  ;;  %v721_v42 = vadd.f32 %v2392_v37, %v711_v36 }
 0x234   : > { %v702_v35 = vmul.f32 %v2848_v33, %v678_v10 }
 0x235   : > { %v713_v39 = vmul.f32 %v2391_v30, %v703_v34 }
 0x236   : > { %v712_v40 = vmul.f32 %v2391_v30, %v702_v35 }
 0x237   : > { %v723_v41 = vadd.f32 %v2392_v37, %v713_v39 }
 0x238   : > { %v722_v43 = vadd.f32 %v2392_v37, %v712_v40 }
 0x239   : > { %v725_v44 = vpack.c.bf16 %v723_v41, %v723_v41 }
 0x23a   : > { %v724_v46 = vpack.c.bf16 %v722_v43, %v721_v42 }
 0x23c   : > { %2579 = vmatprep.mubr.msk.bf16.mxu1 %vm432_vm1, %v724_v46 }
 0x23d   : > { %2580 = vmatmul.mubr.msk.bf16.vlgmr.msra.gmra.mxu1 %vm432_vm1, %v725_v44 }
 0x23e   : > { %2611 = vmatprep.mubr.msk.bf16.mxu1 %vm3018_vm0, %v3945_v1 }
 0x2fd   : > { %v2581_v47 = vpop.f32.mrf.mxu1 }
 0x2fe   : > { %v3199_v48 = vpack.c.bf16 %v2581_v47, %v2581_v47 }
 0x2ff   : > { %v782_v49 = vpop.f32.mrf.mxu1 }
 0x300   : > { %1135 = vrot.lane.b32.xlu0 %v3199_v48, %s3019_s17  ;;  %v823_v50 = vsel %vm803_vm3, %v3199_v48, 0 }
 0x301   : > { %v2582_v51 = vpop.f32.mrf.mxu1  ;;  %2584 = vmatpush3.bf16.xpose.msra.mxu0 %v823_v50 }
 0x302   : > { %2585 = vmatprep.subr.bf16.mxu0 %v3945_v1 }
 0x303   : > { %v785_v52 = vpop.f32.mrf.mxu1 }
 0x304   : > { %v3205_v54 = vpack.c.bf16 %v785_v52, %v782_v49  ;;  %1127 = vrot.lane.b32.xlu0 %v3167_v38, %s3019_s17 }
 0x306   : > { %3950 = vst [vmem:[#allocation2_spill] sm:$0xff] %v3205_v54  ;;  %1133 = vrot.lane.b32.xlu1 %v3205_v54, %s3019_s17  ;;  %v820_v55 = vsel %vm803_vm3, %v3205_v54, 0 }
 0x308   : > { %1459 = vrot.lane.b32.xlu0 %v3199_v48, %s3020_s18 }
 0x309   : > { %2586 = vmatpush3.bf16.xpose.msra.mxu0 %v820_v55 }
 0x30a   : > { %1123 = vrot.lane.b32.xlu1 %v3163_v24, %s3019_s17  ;;  %2631 = vmatprep.subr.bf16.mxu0 %v3945_v1 }
 0x30c   : > { %1457 = vrot.lane.b32.xlu0 %v3205_v54, %s3020_s18 }
 0x30e   : > { %1125 = vrot.lane.b32.xlu1 %v3165_v31, %s3019_s17 }
 0x310   : > { %1449 = vrot.lane.b32.xlu0 %v3165_v31, %s3020_s18  ;;  %2588 = vmatmul.mubr.msk.bf16.vlgmr.msra.gmra.mxu0 %vm803_vm3, %v3163_v24 }
 0x311   : > { %2591 = vmatprep.mubr.msk.bf16.mxu0 %vm3018_vm0, %v3945_v1 }
 0x312   : > { %1129 = vrot.lane.b32.xlu1 %v3169_v45, %s3019_s17 }
 0x314   : > { %1453 = vrot.lane.b32.xlu0 %v3169_v45, %s3020_s18 }
 0x316   : > { %1131 = vrot.lane.b32.xlu1 %v3174_v53, %s3019_s17 }
 0x318   : > { %1455 = vrot.lane.b32.xlu0 %v3174_v53, %s3020_s18  ;;  %2592 = vmatmul.mubr.msk.bf16.gmra.mxu0 %vm803_vm3, %v3165_v31 }
 0x319   : > { %2595 = vmatprep.mubr.msk.bf16.mxu0 %vm3018_vm0, %v3945_v1 }
 0x31a   : > { %1447 = vrot.lane.b32.xlu1 %v3163_v24, %s3020_s18 }
 0x31c   : > { %1771 = vrot.lane.b32.xlu0 %v3163_v24, %s3021_s19 }
 0x31e   : > { %1451 = vrot.lane.b32.xlu1 %v3167_v38, %s3020_s18  ;;  %s3909_s18 = scalar_lea.vmem %s3944_s10, %s2801_s11 }
 0x320   : > { %1775 = vrot.lane.b32.xlu0 %v3167_v38, %s3021_s19  ;;  %2596 = vmatmul.mubr.msk.bf16.gmra.mxu0 %vm803_vm3, %v3167_v38 }
 0x321   : > { %2599 = vmatprep.mubr.msk.bf16.mxu0 %vm3018_vm0, %v3945_v1 }
 0x322   : > { %1783 = vrot.lane.b32.xlu1 %v3199_v48, %s3021_s19 }
 0x324   : > { %1779 = vrot.lane.b32.xlu0 %v3174_v53, %s3021_s19 }
 0x326   : > { %1781 = vrot.lane.b32.xlu1 %v3205_v54, %s3021_s19 }
 0x328   : > { %1348 = vrot.lane.b32.xlu0 %v3199_v48, %s3022_s20  ;;  %2600 = vmatmul.mubr.msk.bf16.gmra.mxu0 %vm803_vm3, %v3169_v45 }
 0x329   : > { %2603 = vmatprep.mubr.msk.bf16.mxu0 %vm3018_vm0, %v3945_v1 }
 0x32a   : > { %1773 = vrot.lane.b32.xlu1 %v3165_v31, %s3021_s19 }
 0x32e   : > { %1777 = vrot.lane.b32.xlu1 %v3169_v45, %s3021_s19 }
 0x330   : > { %2604 = vmatmul.mubr.msk.bf16.gmra.mxu0 %vm803_vm3, %v3174_v53 }
 0x331   : > { %2635 = vmatprep.mubr.msk.bf16.mxu0 %vm3018_vm0, %v3945_v1 }
 0x332   : > { %1018 = vrot.lane.b32.xlu1 %v3199_v48, %s3023_s21 }
 0x336   : > { %1016 = vrot.lane.b32.xlu1 %v3205_v54, %s3023_s21 }
 0x372   : > { %v1136_v24 = vpop.permute.xlu0 %1135 }
 0x373   : > { %v1156_v38 = vsel %vm803_vm3, %v1136_v24, 0 }
 0x374   : > { %2632 = vmatpush3.bf16.xpose.msra.mxu0 %v1156_v38 }
 0x375   : > { %2633 = vmatprep.subr.bf16.mxu0 %v3945_v1 }
 0x376   : > { %v1128_v56 = vpop.permute.xlu0 %1127 }
 0x378   : > { %v1134_v31 = vpop.permute.xlu1 %1133 }
 0x379   : > { %v1153_v45 = vsel %vm803_vm3, %v1134_v31, 0 }
 0x37a   : > { %v1460_v53 = vpop.permute.xlu0 %1459 }
 0x37b   : > { %v1480_v59 = vsel %vm803_vm3, %v1460_v53, 0 }
 0x37c   : > { %v1124_v57 = vpop.permute.xlu1 %1123  ;;  %2634 = vmatpush3.bf16.xpose.msra.mxu0 %v1153_v45 }
 0x37d   : > { %2679 = vmatprep.subr.bf16.mxu0 %v3945_v1 }
 0x37e   : > { %v1458_v61 = vpop.permute.xlu0 %1457 }
 0x37f   : > { %v1477_v63 = vsel %vm803_vm3, %v1458_v61, 0 }
 0x380   : > { %v1126_v58 = vpop.permute.xlu1 %1125 }
 0x382   : > { %v1450_v11 = vpop.permute.xlu0 %1449 }
 0x383   : > { %2636 = vmatmul.mubr.msk.bf16.vlgmr.msra.gmra.mxu0 %vm803_vm3, %v1124_v57 }
 0x384   : > { %v1130_v60 = vpop.permute.xlu1 %1129  ;;  %2680 = vmatpush3.bf16.xpose.msra.mxu0 %v1480_v59  ;;  %2639 = vmatprep.mubr.msk.bf16.mxu0 %vm3018_vm0, %v3945_v1 }
 0x385   : > { %2681 = vmatprep.subr.bf16.mxu0 %v3945_v1 }
 0x386   : > { %v1454_v13 = vpop.permute.xlu0 %1453 }
 0x388   : > { %v1132_v62 = vpop.permute.xlu1 %1131 }
 0x38a   : > { %v1456_v14 = vpop.permute.xlu0 %1455 }
 0x38b   : > { %2640 = vmatmul.mubr.msk.bf16.gmra.mxu0 %vm803_vm3, %v1126_v58 }
 0x38c   : > { %v1448_v0 = vpop.permute.xlu1 %1447  ;;  %2682 = vmatpush3.bf16.xpose.msra.mxu0 %v1477_v63  ;;  %2643 = vmatprep.mubr.msk.bf16.mxu0 %vm3018_vm0, %v3945_v1 }
 0x38d   : > { %2727 = vmatprep.subr.bf16.mxu0 %v3945_v1 }
 0x38e   : > { %v1772_v17 = vpop.permute.xlu0 %1771 }
 0x390   : > { %v1452_v2 = vpop.permute.xlu1 %1451 }
 0x392   : > { %v1776_v30 = vpop.permute.xlu0 %1775 }
 0x393   : > { %2644 = vmatmul.mubr.msk.bf16.gmra.mxu0 %vm803_vm3, %v1128_v56 }
 0x394   : > { %v1784_v3 = vpop.permute.xlu1 %1783  ;;  %2647 = vmatprep.mubr.msk.bf16.mxu0 %vm3018_vm0, %v3945_v1 }
 0x395   : > { %v1804_v10 = vsel %vm803_vm3, %v1784_v3, 0 }
 0x396   : > { %v1780_v43 = vpop.permute.xlu0 %1779 }
 0x398   : > { %v1782_v4 = vpop.permute.xlu1 %1781 }
 0x399   : > { %v1801_v12 = vsel %vm803_vm3, %v1782_v4, 0 }
 0x39b   : > { %2648 = vmatmul.mubr.msk.bf16.gmra.mxu0 %vm803_vm3, %v1130_v60 }
 0x39c   : > { %v1774_v5 = vpop.permute.xlu1 %1773  ;;  %2651 = vmatprep.mubr.msk.bf16.mxu0 %vm3018_vm0, %v3945_v1 }
 0x3a0   : > { %v3274_v6 = vpop.permute.xlu1 %1777 }
 0x3a3   : > { %2652 = vmatmul.mubr.msk.bf16.gmra.mxu0 %vm803_vm3, %v1132_v62 }
 0x3a4   : > { %v1019_v7 = vpop.permute.xlu1 %1018  ;;  %2683 = vmatprep.mubr.msk.bf16.mxu0 %vm3018_vm0, %v3945_v1 }
 0x3a5   : > { %v1038_v8 = vsel %vm1036_vm4, %v1019_v7, 0 }
 0x3a6   : > { %2608 = vmatpush3.bf16.msra.mxu1 %v1038_v8 }
 0x3a7   : > { %2609 = vmatprep.subr.bf16.mxu1 %v3945_v1 }
 0x3a8   : > { %v1017_v9 = vpop.permute.xlu1 %1016 }
 0x3aa   : > { %2610 = vmatpush3.bf16.msra.mxu1 %v1017_v9 }
 0x3ab   : > { %2684 = vmatmul.mubr.msk.bf16.vlgmr.msra.gmra.mxu0 %vm803_vm3, %v1448_v0  ;;  %2655 = vmatprep.subr.bf16.mxu1 %v3945_v1 }
 0x3ac   : > { %2728 = vmatpush3.bf16.xpose.msra.mxu0 %v1804_v10  ;;  %2687 = vmatprep.mubr.msk.bf16.mxu0 %vm3018_vm0, %v3945_v1 }
 0x3ad   : > { %2729 = vmatprep.subr.bf16.mxu0 %v3945_v1 }
 0x3b3   : > { %2688 = vmatmul.mubr.msk.bf16.gmra.mxu0 %vm803_vm3, %v1450_v11 }
 0x3b4   : > { %2730 = vmatpush3.bf16.xpose.msra.mxu0 %v1801_v12  ;;  %2691 = vmatprep.mubr.msk.bf16.mxu0 %vm3018_vm0, %v3945_v1 }
 0x3b5   : > { %2775 = vmatprep.subr.bf16.mxu0 %v3945_v1 }
 0x3bb   : > { %2692 = vmatmul.mubr.msk.bf16.gmra.mxu0 %vm803_vm3, %v1452_v2 }
 0x3bc   : > { %2695 = vmatprep.mubr.msk.bf16.mxu0 %vm3018_vm0, %v3945_v1 }
 0x3c3   : > { %2696 = vmatmul.mubr.msk.bf16.gmra.mxu0 %vm803_vm3, %v1454_v13 }
 0x3c4   : > { %2699 = vmatprep.mubr.msk.bf16.mxu0 %vm3018_vm0, %v3945_v1 }
 0x3cb   : > { %2700 = vmatmul.mubr.msk.bf16.gmra.mxu0 %vm803_vm3, %v1456_v14 }
 0x3cc   : > { %2731 = vmatprep.mubr.msk.bf16.mxu0 %vm3018_vm0, %v3945_v1 }
 0x3d0   : > { %v3301_v15 = vpop.f32.mrf.mxu0 }
 0x3d1   : > { %v899_v16 = vsel %vm898_vm5, %v3301_v15, -inf }
 0x3d2   : > { %900 = vmax.xlane.f32.xlu1 %v899_v16  ;;  %v2589_v18 = vpop.f32.mrf.mxu0 }
 0x3d3   : > { %2732 = vmatmul.mubr.msk.bf16.vlgmr.msra.gmra.mxu0 %vm803_vm3, %v1772_v17 }
 0x3d4   : > { %v3306_v19 = vpop.f32.mrf.mxu0  ;;  %2735 = vmatprep.mubr.msk.bf16.mxu0 %vm3018_vm0, %v3945_v1 }
 0x3d5   : > { %v902_v20 = vsel %vm898_vm5, %v3306_v19, -inf }
 0x3d6   : > { %903 = vmax.xlane.f32.xlu0 %v902_v20  ;;  %v2590_v21 = vpop.f32.mrf.mxu0 }
 0x3d8   : > { %v3312_v22 = vpop.f32.mrf.mxu0 }
 0x3d9   : > { %v905_v23 = vsel %vm898_vm5, %v3312_v22, -inf }
 0x3da   : > { %906 = vmax.xlane.f32.xlu0 %v905_v23  ;;  %v2593_v25 = vpop.f32.mrf.mxu0 }
 0x3db   : > { %2736 = vmatmul.mubr.msk.bf16.gmra.mxu0 %vm803_vm3, %v1774_v5  ;;  %v3383_v5 = vpop.permute.xlu0 %1348 }
 0x3dc   : > { %v3317_v26 = vpop.f32.mrf.mxu0  ;;  %2739 = vmatprep.mubr.msk.bf16.mxu0 %vm3018_vm0, %v3945_v1 }
 0x3dd   : > { %v908_v27 = vsel %vm898_vm5, %v3317_v26, -inf }
 0x3de   : > { %909 = vmax.xlane.f32.xlu0 %v908_v27  ;;  %v2594_v28 = vpop.f32.mrf.mxu0 }
 0x3e0   : > { %v3323_v29 = vpop.f32.mrf.mxu0 }
 0x3e1   : > { %v911_v50 = vsel %vm898_vm5, %v3323_v29, -inf }
 0x3e2   : > { %v2597_v32 = vpop.f32.mrf.mxu0 }
 0x3e3   : > { %2740 = vmatmul.mubr.msk.bf16.gmra.mxu0 %vm803_vm3, %v1776_v30  ;;  %1346 = vrot.lane.b32.xlu1 %v3205_v54, %s3022_s20 }
 0x3e4   : > { %v3328_v33 = vpop.f32.mrf.mxu0  ;;  %2743 = vmatprep.mubr.msk.bf16.mxu0 %vm3018_vm0, %v3945_v1 }
 0x3e5   : > { %v914_v34 = vsel %vm898_vm5, %v3328_v33, -inf }
 0x3e6   : > { %915 = vmax.xlane.f32.xlu0 %v914_v34  ;;  %v2598_v35 = vpop.f32.mrf.mxu0 }
 0x3e8   : > { %v3334_v36 = vpop.f32.mrf.mxu0 }
 0x3e9   : > { %v917_v51 = vsel %vm898_vm5, %v3334_v36, -inf }
 0x3ea   : > { %v2601_v37 = vpop.f32.mrf.mxu0 }
 0x3eb   : > { %2744 = vmatmul.mubr.msk.bf16.gmra.mxu0 %vm803_vm3, %v3274_v6 }
 0x3ec   : > { %v3338_v39 = vpop.f32.mrf.mxu0  ;;  %2747 = vmatprep.mubr.msk.bf16.mxu0 %vm3018_vm0, %v3945_v1 }
 0x3ed   : > { %v920_v40 = vsel %vm898_vm5, %v3338_v39, -inf }
 0x3ee   : > { %921 = vmax.xlane.f32.xlu0 %v920_v40  ;;  %v2602_v41 = vpop.f32.mrf.mxu0 }
 0x3f0   : > { %v3344_v42 = vpop.f32.mrf.mxu0 }
 0x3f1   : > { %v923_v52 = vsel %vm898_vm5, %v3344_v42, -inf }
 0x3f2   : > { %v2605_v44 = vpop.f32.mrf.mxu0 }
 0x3f3   : > { %2748 = vmatmul.mubr.msk.bf16.gmra.mxu0 %vm803_vm3, %v1780_v43 }
 0x3f4   : > { %v3347_v46 = vpop.f32.mrf.mxu0  ;;  %2779 = vmatprep.mubr.msk.bf16.mxu0 %vm3018_vm0, %v3945_v1 }
 0x3f5   : > { %v926_v47 = vsel %vm898_vm5, %v3347_v46, -inf }
 0x3f6   : > { %927 = vmax.xlane.f32.xlu0 %v926_v47  ;;  %v2606_v49 = vpop.f32.mrf.mxu0 }
 0x407   : > { %912 = vmax.xlane.f32.xlu1 %v911_v50 }
 0x40b   : > { %918 = vmax.xlane.f32.xlu1 %v917_v51 }
 0x40f   : > { %924 = vmax.xlane.f32.xlu1 %v923_v52 }
 0x443   : > { %v3359_v55 = vpop.f32.mrf.mxu0 }
 0x444   : > { %v1231_v24 = vsel %vm898_vm5, %v3359_v55, -inf }
 0x445   : > { %1232 = vmax.xlane.f32.xlu1 %v1231_v24  ;;  %v2637_v38 = vpop.f32.mrf.mxu0 }
 0x447   : > { %v3363_v31 = vpop.f32.mrf.mxu0 }
 0x448   : > { %v1234_v56 = vsel %vm898_vm5, %v3363_v31, -inf }
 0x449   : > { %1235 = vmax.xlane.f32.xlu0 %v1234_v56  ;;  %v2638_v45 = vpop.f32.mrf.mxu0 }
 0x44b   : > { %v3367_v57 = vpop.f32.mrf.mxu0 }
 0x44c   : > { %v1237_v53 = vsel %vm898_vm5, %v3367_v57, -inf }
 0x44d   : > { %1238 = vmax.xlane.f32.xlu1 %v1237_v53  ;;  %v2641_v58 = vpop.f32.mrf.mxu0 }
 0x44f   : > { %v3371_v59 = vpop.f32.mrf.mxu0 }
 0x450   : > { %v1240_v60 = vsel %vm898_vm5, %v3371_v59, -inf }
 0x451   : > { %1241 = vmax.xlane.f32.xlu0 %v1240_v60  ;;  %v2642_v61 = vpop.f32.mrf.mxu0 }
 0x453   : > { %v3375_v62 = vpop.f32.mrf.mxu0 }
 0x454   : > { %v1243_v63 = vsel %vm898_vm5, %v3375_v62, -inf }
 0x455   : > { %1244 = vmax.xlane.f32.xlu1 %v1243_v63  ;;  %v2645_v0 = vpop.f32.mrf.mxu0 }
 0x457   : > { %v3379_v2 = vpop.f32.mrf.mxu0 }
 0x458   : > { %v1246_v3 = vsel %vm898_vm5, %v3379_v2, -inf }
 0x459   : > { %1247 = vmax.xlane.f32.xlu0 %v1246_v3  ;;  %v2646_v4 = vpop.f32.mrf.mxu0 }
 0x45b   : > { %v901_v6 = vpop.xlane.xlu1 %900  ;;  %v3385_v7 = vpop.f32.mrf.mxu0 }
 0x45c   : > { %v929_v8 = vsub.f32 %v3301_v15, %v901_v6  ;;  %v1249_v9 = vsel %vm898_vm5, %v3385_v7, -inf }
 0x45d   : > { %1250 = vmax.xlane.f32.xlu1 %v1249_v9  ;;  %v2649_v10 = vpop.f32.mrf.mxu0 }
 0x45e   : > { %v939_v11 = vmul.f32 1.442695, %v929_v8 }
 0x45f   : > { %v904_v12 = vpop.xlane.xlu0 %903  ;;  %v3391_v14 = vpop.f32.mrf.mxu0 }
 0x460   : > { %v930_v13 = vsub.f32 %v3306_v19, %v904_v12  ;;  %2849 = vpow2.f32 %v939_v11  ;;  %v1252_v16 = vsel %vm898_vm5, %v3391_v14, -inf }
 0x461   : > { %1253 = vmax.xlane.f32.xlu0 %v1252_v16  ;;  %v2650_v18 = vpop.f32.mrf.mxu0 }
 0x462   : > { %v941_v17 = vmul.f32 1.442695, %v930_v13 }
 0x463   : > { %v907_v20 = vpop.xlane.xlu0 %906  ;;  %v3396_v21 = vpop.f32.mrf.mxu0 }
 0x464   : > { %v931_v15 = vsub.f32 %v3312_v22, %v907_v20  ;;  %2851 = vpow2.f32 %v941_v17  ;;  %v1255_v23 = vsel %vm898_vm5, %v3396_v21, -inf  ;;  %v3454_v20 = vpop.permute.xlu1 %1346 }
 0x465   : > { %1256 = vmax.xlane.f32.xlu1 %v1255_v23  ;;  %v2653_v19 = vpop.f32.mrf.mxu0 }
 0x466   : > { %v943_v25 = vmul.f32 1.442695, %v931_v15 }
 0x467   : > { %v910_v27 = vpop.xlane.xlu0 %909  ;;  %v3401_v30 = vpop.f32.mrf.mxu0 }
 0x468   : > { %v932_v28 = vsub.f32 %v3317_v26, %v910_v27  ;;  %2853 = vpow2.f32 %v943_v25  ;;  %v1258_v32 = vsel %vm898_vm5, %v3401_v30, -inf }
 0x469   : > { %1259 = vmax.xlane.f32.xlu0 %v1258_v32  ;;  %v2654_v22 = vpop.f32.mrf.mxu0 }
 0x46a   : > { %v945_v34 = vmul.f32 1.442695, %v932_v28 }
 0x46b   : > { %v3405_v35 = vpop.f32.mrf.mxu0 }
 0x46c   : > { %2855 = vpow2.f32 %v945_v34  ;;  %v1555_v37 = vsel %vm898_vm5, %v3405_v35, -inf }
 0x46d   : > { %v3409_v40 = vpop.eup %2849  ;;  %1556 = vmax.xlane.f32.xlu1 %v1555_v37  ;;  %v2685_v41 = vpop.f32.mrf.mxu0 }
 0x46e   : > { %v959_v47 = vsel %vm898_vm5, %v3409_v40, 0.0 }
 0x46f   : > { %v916_v26 = vpop.xlane.xlu0 %915  ;;  %v3412_v44 = vpop.f32.mrf.mxu0 }
 0x470   : > { %v934_v43 = vsub.f32 %v3328_v33, %v916_v26  ;;  %v1558_v49 = vsel %vm898_vm5, %v3412_v44, -inf }
 0x471   : > { %v3418_v50 = vpop.eup %2851  ;;  %960 = vadd.xlane.f32.xlu1 %v959_v47  ;;  %1559 = vmax.xlane.f32.xlu0 %v1558_v49  ;;  %v2686_v52 = vpop.f32.mrf.mxu0 }
 0x472   : > { %v949_v51 = vmul.f32 1.442695, %v934_v43  ;;  %v962_v33 = vsel %vm898_vm5, %v3418_v50, 0.0 }
 0x473   : > { %v3420_v24 = vpop.f32.mrf.mxu0 }
 0x474   : > { %2857 = vpow2.f32 %v949_v51  ;;  %v1561_v38 = vsel %vm898_vm5, %v3420_v24, -inf }
 0x475   : > { %v3426_v56 = vpop.eup %2853  ;;  %963 = vadd.xlane.f32.xlu0 %v962_v33  ;;  %1562 = vmax.xlane.f32.xlu1 %v1561_v38  ;;  %v2689_v45 = vpop.f32.mrf.mxu0 }
 0x476   : > { %v965_v58 = vsel %vm898_vm5, %v3426_v56, 0.0 }
 0x477   : > { %v3428_v53 = vpop.f32.mrf.mxu0  ;;  %v922_v32 = vpop.xlane.xlu0 %921 }
 0x478   : > { %v1564_v60 = vsel %vm898_vm5, %v3428_v53, -inf  ;;  %v936_v43 = vsub.f32 %v3338_v39, %v922_v32 }
 0x479   : > { %v3434_v61 = vpop.eup %2855  ;;  %966 = vadd.xlane.f32.xlu1 %v965_v58  ;;  %1565 = vmax.xlane.f32.xlu0 %v1564_v60  ;;  %v2690_v63 = vpop.f32.mrf.mxu0 }
 0x47a   : > { %v968_v3 = vsel %vm898_vm5, %v3434_v61, 0.0  ;;  %v953_v52 = vmul.f32 1.442695, %v936_v43 }
 0x47b   : > { %v3436_v0 = vpop.f32.mrf.mxu0 }
 0x47c   : > { %v1567_v4 = vsel %vm898_vm5, %v3436_v0, -inf }
 0x47d   : > { %969 = vadd.xlane.f32.xlu0 %v968_v3  ;;  %1568 = vmax.xlane.f32.xlu1 %v1567_v4  ;;  %v2693_v6 = vpop.f32.mrf.mxu0 }
 0x47f   : > { %v3442_v8 = vpop.f32.mrf.mxu0  ;;  %v928_v3 = vpop.xlane.xlu0 %927 }
 0x480   : > { %v1570_v9 = vsel %vm898_vm5, %v3442_v8, -inf }
 0x481   : > { %v3446_v10 = vpop.eup %2857  ;;  %1571 = vmax.xlane.f32.xlu0 %v1570_v9  ;;  %v2694_v11 = vpop.f32.mrf.mxu0 }
 0x482   : > { %v974_v13 = vsel %vm898_vm5, %v3446_v10, 0.0  ;;  %v938_v11 = vsub.f32 %v3347_v46, %v928_v3 }
 0x483   : > { %v3448_v12 = vpop.f32.mrf.mxu0 }
 0x485   : > { %975 = vadd.xlane.f32.xlu0 %v974_v13  ;;  %v2697_v16 = vpop.f32.mrf.mxu0  ;;  %v1573_v13 = vsel %vm898_vm5, %v3448_v12, -inf }
 0x487   : > { %v3452_v17 = vpop.f32.mrf.mxu0 }
 0x489   : > { %v2698_v18 = vpop.f32.mrf.mxu0 }
 0x48b   : > { %v3456_v15 = vpop.f32.mrf.mxu0 }
 0x48c   : > { %v1579_v43 = vsel %vm898_vm5, %v3456_v15, -inf }
 0x48d   : > { %v2701_v23 = vpop.f32.mrf.mxu0 }
 0x48e   : > { %v957_v23 = vmul.f32 1.442695, %v938_v11 }
 0x48f   : > { %v3458_v25 = vpop.f32.mrf.mxu0 }
 0x490   : > { %v913_v19 = vpop.xlane.xlu1 %912 }
 0x491   : > { %v933_v27 = vsub.f32 %v3323_v29, %v913_v19  ;;  %v2702_v28 = vpop.f32.mrf.mxu0  ;;  %v1576_v19 = vsel %vm898_vm5, %v3452_v17, -inf }
 0x493   : > { %v947_v34 = vmul.f32 1.442695, %v933_v27  ;;  %v3461_v22 = vpop.f32.mrf.mxu0 }
 0x494   : > { %v919_v37 = vpop.xlane.xlu1 %918  ;;  %v1879_v11 = vsel %vm898_vm5, %v3461_v22, -inf }
 0x495   : > { %2859 = vpow2.f32 %v947_v34  ;;  %v935_v41 = vsub.f32 %v3334_v36, %v919_v37  ;;  %v2733_v26 = vpop.f32.mrf.mxu0 }
 0x497   : > { %v951_v47 = vmul.f32 1.442695, %v935_v41  ;;  %v3465_v49 = vpop.f32.mrf.mxu0 }
 0x498   : > { %v925_v33 = vpop.xlane.xlu1 %924  ;;  %v1882_v27 = vsel %vm898_vm5, %v3465_v49, -inf }
 0x499   : > { %2861 = vpow2.f32 %v951_v47  ;;  %v2734_v51 = vpop.f32.mrf.mxu0  ;;  %v937_v45 = vsub.f32 %v3344_v42, %v925_v33 }
 0x49a   : > { %2863 = vpow2.f32 %v953_v52 }
 0x49b   : > { %v3467_v29 = vpop.f32.mrf.mxu0  ;;  %v955_v63 = vmul.f32 1.442695, %v937_v45 }
 0x49d   : > { %v2737_v38 = vpop.f32.mrf.mxu0  ;;  %2865 = vpow2.f32 %v955_v63 }
 0x49e   : > { %2867 = vpow2.f32 %v957_v23 }
 0x49f   : > { %v3470_v58 = vpop.f32.mrf.mxu0 }
 0x4a1   : > { %v2738_v36 = vpop.f32.mrf.mxu0 }
 0x4a2   : > { %v3472_v60 = vpop.eup %2859 }
 0x4a3   : > { %v971_v39 = vsel %vm898_vm5, %v3472_v60, 0.0  ;;  %v3476_v4 = vpop.f32.mrf.mxu0 }
 0x4a4   : > { %972 = vadd.xlane.f32.xlu1 %v971_v39  ;;  %v1582_v39 = vsel %vm898_vm5, %v3458_v25, -inf }
 0x4a5   : > { %v2741_v9 = vpop.f32.mrf.mxu0 }
 0x4a6   : > { %v3478_v6 = vpop.eup %2861 }
 0x4a7   : > { %v977_v42 = vsel %vm898_vm5, %v3478_v6, 0.0  ;;  %v3485_v16 = vpop.f32.mrf.mxu0  ;;  %v3491_v46 = vpop.eup %2863 }
 0x4a8   : > { %978 = vadd.xlane.f32.xlu0 %v977_v42  ;;  %1574 = vmax.xlane.f32.xlu1 %v1573_v13  ;;  %v980_v34 = vsel %vm898_vm5, %v3491_v46, 0.0  ;;  %v1885_v42 = vsel %vm898_vm5, %v3467_v29, -inf  ;;  %v1888_v13 = vsel %vm898_vm5, %v3470_v58, -inf }
 0x4a9   : > { %v2742_v18 = vpop.f32.mrf.mxu0 }
 0x4aa   : > { %v3503_v47 = vpop.eup %2865 }
 0x4ab   : > { %v3493_v28 = vpop.f32.mrf.mxu0  ;;  %v983_v38 = vsel %vm898_vm5, %v3503_v47, 0.0  ;;  %v3517_v3 = vpop.eup %2867 }
 0x4ac   : > { %1577 = vmax.xlane.f32.xlu0 %v1576_v19  ;;  %1883 = vmax.xlane.f32.xlu1 %v1882_v27  ;;  %v986_v9 = vsel %vm898_vm5, %v3517_v3, 0.0  ;;  %v1891_v19 = vsel %vm898_vm5, %v3476_v4, -inf }
 0x4ad   : > { %v2745_v32 = vpop.f32.mrf.mxu0 }
 0x4af   : > { %v3497_v37 = vpop.f32.mrf.mxu0 }
 0x4b0   : > { %981 = vadd.xlane.f32.xlu0 %v980_v34  ;;  %v1900_v41 = vsel %vm898_vm5, %v3497_v37, -inf }
 0x4b1   : > { %1901 = vmax.xlane.f32.xlu1 %v1900_v41  ;;  %v2746_v26 = vpop.f32.mrf.mxu0  ;;  %v1894_v41 = vsel %vm898_vm5, %v3485_v16, -inf }
 0x4b3   : > { %v3505_v51 = vpop.f32.mrf.mxu0 }
 0x4b4   : > { %3951 = vst [vmem:[#allocation3_spill] sm:$0xff] %v3505_v51  ;;  %1580 = vmax.xlane.f32.xlu0 %v1579_v43  ;;  %v1903_v52 = vsel %vm898_vm5, %v3505_v51, -inf }
 0x4b5   : > { %1904 = vmax.xlane.f32.xlu1 %v1903_v52  ;;  %v2749_v33 = vpop.f32.mrf.mxu0 }
 0x4b7   : > { %v3511_v45 = vpop.f32.mrf.mxu0 }
 0x4b8   : > { %3952 = vst [vmem:[#allocation4_spill] sm:$0xff] %v3511_v45  ;;  %984 = vadd.xlane.f32.xlu0 %v983_v38  ;;  %v1906_v36 = vsel %vm898_vm5, %v3511_v45, -inf }
 0x4b9   : > { %1907 = vmax.xlane.f32.xlu1 %v1906_v36  ;;  %v2750_v63 = vpop.f32.mrf.mxu0 }
 0x4bc   : > { %1583 = vmax.xlane.f32.xlu0 %v1582_v39 }
 0x4c0   : > { %987 = vadd.xlane.f32.xlu0 %v986_v9 }
 0x4c4   : > { %1880 = vmax.xlane.f32.xlu0 %v1879_v11 }
 0x4c8   : > { %1886 = vmax.xlane.f32.xlu0 %v1885_v42 }
 0x4cc   : > { %1889 = vmax.xlane.f32.xlu0 %v1888_v13 }
 0x4ce   : > { %v1233_v18 = vpop.xlane.xlu1 %1232 }
 0x4cf   : > { %v1261_v23 = vsub.f32 %v3359_v55, %v1233_v18  ;;  %v1897_v55 = vsel %vm898_vm5, %v3493_v28, -inf }
 0x4d0   : > { %1892 = vmax.xlane.f32.xlu0 %v1891_v19 }
 0x4d1   : > { %v1271_v27 = vmul.f32 1.442695, %v1261_v23 }
 0x4d2   : > { %v1236_v32 = vpop.xlane.xlu0 %1235 }
 0x4d3   : > { %2869 = vpow2.f32 %v1271_v27  ;;  %v1262_v34 = vsub.f32 %v3363_v31, %v1236_v32 }
 0x4d4   : > { %1895 = vmax.xlane.f32.xlu0 %v1894_v41 }
 0x4d5   : > { %v1273_v26 = vmul.f32 1.442695, %v1262_v34 }
 0x4d6   : > { %v1239_v43 = vpop.xlane.xlu1 %1238 }
 0x4d7   : > { %2871 = vpow2.f32 %v1273_v26  ;;  %v1263_v52 = vsub.f32 %v3367_v57, %v1239_v43 }
 0x4d8   : > { %1898 = vmax.xlane.f32.xlu0 %v1897_v55 }
 0x4d9   : > { %v1275_v33 = vmul.f32 1.442695, %v1263_v52 }
 0x4da   : > { %v1242_v38 = vpop.xlane.xlu0 %1241 }
 0x4db   : > { %2873 = vpow2.f32 %v1275_v33  ;;  %v1264_v36 = vsub.f32 %v3371_v59, %v1242_v38 }
 0x4dd   : > { %v1277_v63 = vmul.f32 1.442695, %v1264_v36 }
 0x4de   : > { %v1245_v59 = vpop.xlane.xlu1 %1244 }
 0x4df   : > { %2875 = vpow2.f32 %v1277_v63  ;;  %v1265_v36 = vsub.f32 %v3375_v62, %v1245_v59 }
 0x4e0   : > { %v3537_v31 = vpop.eup %2869 }
 0x4e1   : > { %v1291_v39 = vsel %vm898_vm5, %v3537_v31, 0.0 }
 0x4e2   : > { %1292 = vadd.xlane.f32.xlu0 %v1291_v39  ;;  %v1248_v23 = vpop.xlane.xlu0 %1247 }
 0x4e3   : > { %v1266_v39 = vsub.f32 %v3379_v2, %v1248_v23 }
 0x4e4   : > { %v3541_v9 = vpop.eup %2871 }
 0x4e5   : > { %v1294_v57 = vsel %vm898_vm5, %v3541_v9, 0.0 }
 0x4e6   : > { %1295 = vadd.xlane.f32.xlu0 %v1294_v57  ;;  %v1251_v19 = vpop.xlane.xlu1 %1250  ;;  %v1279_v57 = vmul.f32 1.442695, %v1265_v36 }
 0x4e7   : > { %v1267_v1 = vsub.f32 %v3385_v7, %v1251_v19  ;;  %v1367_v7 = vsel %vm1036_vm4, %v3383_v5, 0 }
 0x4e8   : > { %v3545_v11 = vpop.eup %2873 }
 0x4e9   : > { %v1297_v42 = vsel %vm898_vm5, %v3545_v11, 0.0  ;;  %v1283_v59 = vmul.f32 1.442695, %v1267_v1 }
 0x4ea   : > { %1298 = vadd.xlane.f32.xlu0 %v1297_v42  ;;  %v1254_v27 = vpop.xlane.xlu0 %1253 }
 0x4eb   : > { %v1268_v2 = vsub.f32 %v3391_v14, %v1254_v27 }
 0x4ec   : > { %v3549_v13 = vpop.eup %2875 }
 0x4ed   : > { %v1300_v18 = vsel %vm898_vm5, %v3549_v13, 0.0 }
 0x4ee   : > { %1301 = vadd.xlane.f32.xlu1 %v1300_v18  ;;  %v1257_v32 = vpop.xlane.xlu1 %1256 }
 0x4ef   : > { %v1269_v42 = vsub.f32 %v3396_v21, %v1257_v32 }
 0x4f2   : > { %v1260_v34 = vpop.xlane.xlu0 %1259 }
 0x4f3   : > { %v1270_v1 = vsub.f32 %v3401_v30, %v1260_v34 }
 0x4f6   : > { %v1557_v41 = vpop.xlane.xlu1 %1556 }
 0x4fa   : > { %v961_v26 = vpop.xlane.xlu1 %960  ;;  %v1560_v43 = vpop.xlane.xlu0 %1559 }
 0x4fb   : > { %2877 = vrcp.f32 %v961_v26  ;;  %v1281_v26 = vmul.f32 1.442695, %v1266_v39  ;;  %v1586_v32 = vsub.f32 %v3412_v44, %v1560_v43 }
 0x4fd   : > { %v1597_v14 = vmul.f32 1.442695, %v1586_v32 }
 0x4fe   : > { %v964_v52 = vpop.xlane.xlu0 %963  ;;  %v1563_v55 = vpop.xlane.xlu1 %1562 }
 0x4ff   : > { %1670 = vrot.lane.b32.xlu1 %v3205_v54, %s3024_s22  ;;  %2879 = vrcp.f32 %v964_v52  ;;  %v1287_v54 = vmul.f32 1.442695, %v1269_v42  ;;  %v1585_v52 = vsub.f32 %v3405_v35, %v1557_v41  ;;  %v3953_v35 = vmov 0.0  }
 0x500   : > { %1672 = vrot.lane.b32.xlu0 %v3199_v48, %s3024_s22  ;;  %v1587_v44 = vsub.f32 %v3420_v24, %v1563_v55 }
 0x501   : > { %v1595_v21 = vmul.f32 1.442695, %v1585_v52 }
 0x502   : > { %v1566_v33 = vpop.xlane.xlu0 %1565  ;;  %v967_v38 = vpop.xlane.xlu1 %966  ;;  %v1599_v30 = vmul.f32 1.442695, %v1587_v44 }
 0x503   : > { %2881 = vrcp.f32 %v967_v38  ;;  %v1588_v27 = vsub.f32 %v3428_v53, %v1566_v33 }
 0x506   : > { %v970_v63 = vpop.xlane.xlu0 %969  ;;  %v1569_v24 = vpop.xlane.xlu1 %1568 }
 0x507   : > { %2883 = vrcp.f32 %v970_v63  ;;  %v1589_v53 = vsub.f32 %v3436_v0, %v1569_v24 }
 0x508   : > { %v2878_v18 = vpop.eup %2877  ;;  %2885 = vpow2.f32 %v1279_v57 }
 0x509   : > { %v999_v51 = vmul.f32 %v2878_v18, %v3409_v40  ;;  %2887 = vpow2.f32 %v1281_v26  ;;  %v1285_v40 = vmul.f32 1.442695, %v1268_v2  ;;  %v1603_v38 = vmul.f32 1.442695, %v1589_v53 }
 0x50a   : > { %2889 = vpow2.f32 %v1287_v54 }
 0x50b   : > { %2891 = vpow2.f32 %v1283_v59 }
 0x50c   : > { %v2880_v45 = vpop.eup %2879  ;;  %2893 = vpow2.f32 %v1595_v21 }
 0x50d   : > { %v1000_v62 = vmul.f32 %v2880_v45, %v3418_v50  ;;  %v1572_v50 = vpop.xlane.xlu0 %1571  ;;  %2895 = vpow2.f32 %v1285_v40  ;;  %v1289_v45 = vmul.f32 1.442695, %v1270_v1 }
 0x50e   : > { %2897 = vpow2.f32 %v1597_v14  ;;  %v1590_v34 = vsub.f32 %v3442_v8, %v1572_v50 }
 0x50f   : > { %v1009_v23 = vpack.c.bf16 %v1000_v62, %v999_v51  ;;  %2899 = vpow2.f32 %v1289_v45 }
 0x510   : > { %v2882_v19 = vpop.eup %2881  ;;  %2901 = vpow2.f32 %v1599_v30 }
 0x511   : > { %2612 = vmatmul.mubr.msk.bf16.vlgmr.msra.gmra.mxu1 %vm898_vm5, %v1009_v23  ;;  %v1001_v5 = vmul.f32 %v2882_v19, %v3426_v56  ;;  %v1601_v56 = vmul.f32 1.442695, %v1588_v27  ;;  %v976_v26 = vpop.xlane.xlu0 %975 }
 0x512   : > { %2656 = vmatpush3.bf16.msra.mxu1 %v1367_v7  ;;  %2615 = vmatprep.mubr.msk.bf16.mxu1 %vm3018_vm0, %v3953_v35 }
 0x513   : > { %2657 = vmatprep.subr.bf16.mxu1 %v3953_v35  ;;  %2903 = vpow2.f32 %v1601_v56 }
 0x514   : > { %v2884_v54 = vpop.eup %2883 }
 0x515   : > { %v1002_v51 = vmul.f32 %v2884_v54, %v3434_v61  ;;  %v3578_v43 = vpop.eup %2885 }
 0x516   : > { %2658 = vmatpush3.bf16.msra.mxu1 %v3454_v20  ;;  %v3583_v61 = vpop.eup %2887  ;;  %v1605_v20 = vmul.f32 1.442695, %v1590_v34  ;;  %v1303_v55 = vsel %vm898_vm5, %v3578_v43, 0.0 }
 0x517   : > { %v1010_v41 = vpack.c.bf16 %v1002_v51, %v1001_v5  ;;  %2703 = vmatprep.subr.bf16.mxu1 %v3953_v35  ;;  %v3588_v8 = vpop.eup %2889  ;;  %v1306_v63 = vsel %vm898_vm5, %v3583_v61, 0.0 }
 0x518   : > { %v3590_v33 = vpop.eup %2891  ;;  %2905 = vpow2.f32 %v1605_v20  ;;  %v1315_v36 = vsel %vm898_vm5, %v3588_v8, 0.0 }
 0x519   : > { %2616 = vmatmul.mubr.msk.bf16.gmra.mxu1 %vm898_vm5, %v1010_v41  ;;  %v3596_v39 = vpop.eup %2893  ;;  %2907 = vpow2.f32 %v1603_v38  ;;  %v1309_v42 = vsel %vm898_vm5, %v3590_v33, 0.0 }
 0x51a   : > { %2619 = vmatprep.mubr.msk.bf16.mxu1 %vm3018_vm0, %v3953_v35  ;;  %v3598_v0 = vpop.eup %2895  ;;  %v1615_v57 = vsel %vm898_vm5, %v3596_v39, 0.0  ;;  %2909 = vrcp.f32 %v976_v26 }
 0x51b   : > { %v3604_v18 = vpop.eup %2897  ;;  %v1312_v59 = vsel %vm898_vm5, %v3598_v0, 0.0 }
 0x51c   : > { %v3606_v52 = vpop.eup %2899  ;;  %v1618_v62 = vsel %vm898_vm5, %v3604_v18, 0.0 }
 0x51d   : > { %v3612_v2 = vpop.eup %2901  ;;  %v1318_v7 = vsel %vm898_vm5, %v3606_v52, 0.0 }
 0x51e   : > { %v1621_v32 = vsel %vm898_vm5, %v3612_v2, 0.0 }
 0x51f   : > { %1304 = vadd.xlane.f32.xlu0 %v1303_v55 }
 0x520   : > { %v3614_v21 = vpop.eup %2903 }
 0x521   : > { %v1624_v14 = vsel %vm898_vm5, %v3614_v21, 0.0 }
 0x523   : > { %1316 = vadd.xlane.f32.xlu0 %v1315_v36  ;;  %1307 = vadd.xlane.f32.xlu1 %v1306_v63 }
 0x525   : > { %v3620_v19 = vpop.eup %2905 }
 0x526   : > { %v1630_v44 = vsel %vm898_vm5, %v3620_v19, 0.0  ;;  %v3627_v50 = vpop.eup %2907 }
 0x527   : > { %1616 = vadd.xlane.f32.xlu0 %v1615_v57  ;;  %1310 = vadd.xlane.f32.xlu1 %v1309_v42  ;;  %v1627_v27 = vsel %vm898_vm5, %v3627_v50, 0.0  ;;  %v2910_v41 = vpop.eup %2909 }
 0x528   : > { %v1004_v56 = vmul.f32 %v2910_v41, %v3446_v10 }
 0x52b   : > { %1619 = vadd.xlane.f32.xlu0 %v1618_v62  ;;  %1313 = vadd.xlane.f32.xlu1 %v1312_v59 }
 0x52d   : > { %v973_v23 = vpop.xlane.xlu1 %972 }
 0x52e   : > { %2911 = vrcp.f32 %v973_v23 }
 0x52f   : > { %1622 = vadd.xlane.f32.xlu0 %v1621_v32  ;;  %1319 = vadd.xlane.f32.xlu1 %v1318_v7 }
 0x531   : > { %v979_v40 = vpop.xlane.xlu0 %978  ;;  %v1575_v1 = vpop.xlane.xlu1 %1574 }
 0x532   : > { %v1591_v54 = vsub.f32 %v3448_v12, %v1575_v1 }
 0x533   : > { %1625 = vadd.xlane.f32.xlu0 %v1624_v14  ;;  %1631 = vadd.xlane.f32.xlu1 %v1630_v44 }
 0x534   : > { %v1607_v5 = vmul.f32 1.442695, %v1591_v54 }
 0x535   : > { %v1578_v51 = vpop.xlane.xlu0 %1577  ;;  %v1884_v59 = vpop.xlane.xlu1 %1883 }
 0x536   : > { %2913 = vpow2.f32 %v1607_v5  ;;  %v1592_v45 = vsub.f32 %v3452_v17, %v1578_v51 }
 0x537   : > { %1628 = vadd.xlane.f32.xlu0 %v1627_v27  ;;  %2915 = vrcp.f32 %v979_v40  ;;  %v1910_v40 = vsub.f32 %v3465_v49, %v1884_v59 }
 0x538   : > { %v1609_v12 = vmul.f32 1.442695, %v1592_v45 }
 0x539   : > { %v982_v30 = vpop.xlane.xlu0 %981  ;;  %v1921_v44 = vmul.f32 1.442695, %v1910_v40 }
 0x53a   : > { %2917 = vpow2.f32 %v1609_v12 }
 0x53b   : > { %v2912_v34 = vpop.eup %2911  ;;  %2919 = vrcp.f32 %v982_v30 }
 0x53c   : > { %v1003_v24 = vmul.f32 %v2912_v34, %v3472_v60 }
 0x53d   : > { %v1581_v53 = vpop.xlane.xlu0 %1580 }
 0x53e   : > { %v1593_v20 = vsub.f32 %v3456_v15, %v1581_v53  ;;  %v1011_v55 = vpack.c.bf16 %v1004_v56, %v1003_v24 }
 0x540   : > { %v1611_v17 = vmul.f32 1.442695, %v1593_v20  ;;  %2620 = vmatmul.mubr.msk.bf16.gmra.mxu1 %vm898_vm5, %v1011_v55 }
 0x541   : > { %v985_v38 = vpop.xlane.xlu0 %984  ;;  %2623 = vmatprep.mubr.msk.bf16.mxu1 %vm3018_vm0, %v3953_v35 }
 0x542   : > { %2921 = vpow2.f32 %v1611_v17 }
 0x543   : > { %v3638_v36 = vpop.eup %2913  ;;  %2923 = vrcp.f32 %v985_v38 }
 0x544   : > { %v1633_v63 = vsel %vm898_vm5, %v3638_v36, 0.0  ;;  %v2916_v10 = vpop.eup %2915 }
 0x545   : > { %v1584_v60 = vpop.xlane.xlu0 %1583  ;;  %1634 = vadd.xlane.f32.xlu1 %v1633_v63  ;;  %v1005_v32 = vmul.f32 %v2916_v10, %v3478_v6 }
 0x546   : > { %v1594_v57 = vsub.f32 %v3458_v25, %v1584_v60 }
 0x547   : > { %v3643_v15 = vpop.eup %2917 }
 0x548   : > { %v1613_v42 = vmul.f32 1.442695, %v1594_v57  ;;  %v1636_v26 = vsel %vm898_vm5, %v3643_v15, 0.0  ;;  %v2920_v62 = vpop.eup %2919 }
 0x549   : > { %v988_v23 = vpop.xlane.xlu0 %987  ;;  %1637 = vadd.xlane.f32.xlu1 %v1636_v26  ;;  %v1006_v7 = vmul.f32 %v2920_v62, %v3491_v46 }
 0x54a   : > { %2925 = vpow2.f32 %v1613_v42 }
 0x54b   : > { %2927 = vrcp.f32 %v988_v23  ;;  %v1012_v25 = vpack.c.bf16 %v1006_v7, %v1005_v32 }
 0x54d   : > { %v1881_v1 = vpop.xlane.xlu0 %1880  ;;  %2624 = vmatmul.mubr.msk.bf16.gmra.mxu1 %vm898_vm5, %v1012_v25 }
 0x54e   : > { %v1909_v54 = vsub.f32 %v3461_v22, %v1881_v1  ;;  %2627 = vmatprep.mubr.msk.bf16.mxu1 %vm3018_vm0, %v3953_v35 }
 0x54f   : > { %v3652_v14 = vpop.eup %2921 }
 0x550   : > { %v1919_v5 = vmul.f32 1.442695, %v1909_v54  ;;  %v1639_v6 = vsel %vm898_vm5, %v3652_v14, 0.0  ;;  %v2924_v27 = vpop.eup %2923 }
 0x551   : > { %v1887_v46 = vpop.xlane.xlu0 %1886  ;;  %1640 = vadd.xlane.f32.xlu0 %v1639_v6  ;;  %v1007_v56 = vmul.f32 %v2924_v27, %v3503_v47 }
 0x552   : > { %2929 = vpow2.f32 %v1919_v5  ;;  %v1911_v49 = vsub.f32 %v3467_v29, %v1887_v46 }
 0x553   : > { %2931 = vpow2.f32 %v1921_v44 }
 0x554   : > { %v1923_v51 = vmul.f32 1.442695, %v1911_v49 }
 0x555   : > { %v1890_v45 = vpop.xlane.xlu0 %1889 }
 0x556   : > { %v1912_v22 = vsub.f32 %v3470_v58, %v1890_v45  ;;  %2933 = vpow2.f32 %v1923_v51  ;;  %v1902_v58 = vpop.xlane.xlu1 %1901 }
 0x557   : > { %v3660_v12 = vpop.eup %2925  ;;  %v1916_v47 = vsub.f32 %v3497_v37, %v1902_v58  ;;  %v3954_v58 = vld [vmem:[#allocation3_spill] sm:$0xff] }
 0x558   : > { %v2928_v41 = vpop.eup %2927  ;;  %v1925_v30 = vmul.f32 1.442695, %v1912_v22  ;;  %v1642_v34 = vsel %vm898_vm5, %v3660_v12, 0.0 }
 0x559   : > { %v1893_v24 = vpop.xlane.xlu0 %1892  ;;  %1643 = vadd.xlane.f32.xlu1 %v1642_v34  ;;  %v1008_v29 = vmul.f32 %v2928_v41, %v3517_v3  ;;  %v1933_v42 = vmul.f32 1.442695, %v1916_v47  ;;  %v3956_v47 = vld [vmem:[#allocation4_spill] sm:$0xff] }
 0x55a   : > { %2935 = vpow2.f32 %v1925_v30  ;;  %v1913_v53 = vsub.f32 %v3476_v4, %v1893_v24  ;;  %v1905_v40 = vpop.xlane.xlu1 %1904 }
 0x55b   : > { %v1013_v20 = vpack.c.bf16 %v1008_v29, %v1007_v56 }
 0x55c   : > { %v1927_v55 = vmul.f32 1.442695, %v1913_v53 }
 0x55d   : > { %2628 = vmatmul.mubr.msk.bf16.gmra.mxu1 %vm898_vm5, %v1013_v20  ;;  %v1896_v17 = vpop.xlane.xlu0 %1895 }
 0x55e   : > { %2937 = vpow2.f32 %v1927_v55  ;;  %v1914_v38 = vsub.f32 %v3485_v16, %v1896_v17  ;;  %2659 = vmatprep.mubr.msk.bf16.mxu1 %vm3018_vm0, %v3953_v35  ;;  %v1908_v5 = vpop.xlane.xlu1 %1907  ;;  %v1917_v17 = vsub.f32 %v3954_v58, %v1905_v40 }
 0x55f   : > { %v3671_v63 = vpop.eup %2929 }
 0x560   : > { %v1929_v3 = vmul.f32 1.442695, %v1914_v38  ;;  %v1939_v4 = vsel %vm898_vm5, %v3671_v63, 0.0  ;;  %v3676_v60 = vpop.eup %2931  ;;  %v3955_v38 = vld [vmem:[#allocation2_spill] sm:$0xff] }
 0x561   : > { %1940 = vadd.xlane.f32.xlu0 %v1939_v4  ;;  %v1899_v10 = vpop.xlane.xlu0 %1898  ;;  %v1942_v26 = vsel %vm898_vm5, %v3676_v60, 0.0 }
 0x562   : > { %2939 = vpow2.f32 %v1929_v3  ;;  %v1915_v57 = vsub.f32 %v3493_v28, %v1899_v10  ;;  %v1918_v3 = vsub.f32 %v3956_v47, %v1908_v5 }
 0x563   : > { %v3681_v62 = vpop.eup %2933 }
 0x564   : > { %v1931_v16 = vmul.f32 1.442695, %v1915_v57  ;;  %v1945_v59 = vsel %vm898_vm5, %v3681_v62, 0.0 }
 0x565   : > { %1943 = vadd.xlane.f32.xlu0 %v1942_v26 }
 0x566   : > { %2941 = vpow2.f32 %v1931_v16 }
 0x567   : > { %v3683_v37 = vpop.eup %2935  ;;  %2943 = vpow2.f32 %v1933_v42 }
 0x568   : > { %v1948_v23 = vsel %vm898_vm5, %v3683_v37, 0.0 }
 0x569   : > { %1946 = vadd.xlane.f32.xlu0 %v1945_v59  ;;  %1949 = vadd.xlane.f32.xlu1 %v1948_v23 }
 0x56b   : > { %v3689_v28 = vpop.eup %2937  ;;  %v1293_v32 = vpop.xlane.xlu0 %1292 }
 0x56c   : > { %v1951_v7 = vsel %vm898_vm5, %v3689_v28, 0.0  ;;  %2945 = vrcp.f32 %v1293_v32 }
 0x56d   : > { %1952 = vadd.xlane.f32.xlu0 %v1951_v7 }
 0x56f   : > { %v3693_v25 = vpop.eup %2939  ;;  %v1296_v1 = vpop.xlane.xlu0 %1295 }
 0x570   : > { %2947 = vrcp.f32 %v1296_v1  ;;  %v1954_v54 = vsel %vm898_vm5, %v3693_v25, 0.0 }
 0x571   : > { %1955 = vadd.xlane.f32.xlu1 %v1954_v54 }
 0x573   : > { %v3697_v44 = vpop.eup %2941  ;;  %v1299_v6 = vpop.xlane.xlu0 %1298 }
 0x574   : > { %v1957_v46 = vsel %vm898_vm5, %v3697_v44, 0.0  ;;  %v3701_v49 = vpop.eup %2943  ;;  %2949 = vrcp.f32 %v1299_v6 }
 0x575   : > { %1958 = vadd.xlane.f32.xlu1 %v1957_v46  ;;  %v1960_v45 = vsel %vm898_vm5, %v3701_v49, 0.0 }
 0x577   : > { %v1302_v51 = vpop.xlane.xlu1 %1301  ;;  %v1673_v34 = vpop.permute.xlu0 %1672 }
 0x578   : > { %2951 = vrcp.f32 %v1302_v51  ;;  %v1691_v56 = vsel %vm1036_vm4, %v1673_v34, 0 }
 0x579   : > { %1961 = vadd.xlane.f32.xlu1 %v1960_v45  ;;  %v2946_v27 = vpop.eup %2945 }
 0x57a   : > { %v1331_v41 = vmul.f32 %v2946_v27, %v3537_v31 }
 0x57b   : > { %v1671_v31 = vpop.permute.xlu1 %1670 }
 0x57d   : > { %v2948_v22 = vpop.eup %2947 }
 0x57e   : > { %v1332_v30 = vmul.f32 %v2948_v22, %v3541_v9 }
 0x580   : > { %v1341_v24 = vpack.c.bf16 %v1332_v30, %v1331_v41 }
 0x581   : > { %v2950_v29 = vpop.eup %2949 }
 0x582   : > { %2660 = vmatmul.mubr.msk.bf16.vlgmr.msra.gmra.mxu1 %vm898_vm5, %v1341_v24  ;;  %v1333_v9 = vmul.f32 %v2950_v29, %v3545_v11  ;;  %v1937_v11 = vmul.f32 1.442695, %v1918_v3 }
 0x583   : > { %2704 = vmatpush3.bf16.msra.mxu1 %v1691_v56  ;;  %1996 = vrot.lane.b32.xlu0 %v3199_v48, %s3025_s23  ;;  %v1935_v48 = vmul.f32 1.442695, %v1917_v17 }
 0x584   : > { %2705 = vmatprep.subr.bf16.mxu1 %v3953_v35  ;;  %2663 = vmatprep.mubr.msk.bf16.mxu1 %vm3018_vm0, %v3953_v35 }
 0x585   : > { %v2952_v53 = vpop.eup %2951  ;;  %2953 = vpow2.f32 %v1935_v48 }
 0x586   : > { %v1334_v20 = vmul.f32 %v2952_v53, %v3549_v13  ;;  %2955 = vpow2.f32 %v1937_v11 }
 0x587   : > { %2706 = vmatpush3.bf16.msra.mxu1 %v1671_v31 }
 0x588   : > { %v1342_v55 = vpack.c.bf16 %v1334_v20, %v1333_v9  ;;  %2751 = vmatprep.subr.bf16.mxu1 %v3953_v35 }
 0x58a   : > { %1994 = vrot.lane.b32.xlu1 %v3955_v38, %s3025_s23  ;;  %2664 = vmatmul.mubr.msk.bf16.gmra.mxu1 %vm898_vm5, %v1342_v55 }
 0x58b   : > { %2667 = vmatprep.mubr.msk.bf16.mxu1 %vm3018_vm0, %v3953_v35 }
 0x592   : > { %v3722_v13 = vpop.eup %2953 }
 0x593   : > { %v1963_v4 = vsel %vm898_vm5, %v3722_v13, 0.0  ;;  %v3726_v57 = vpop.eup %2955 }
 0x594   : > { %v1966_v16 = vsel %vm898_vm5, %v3726_v57, 0.0 }
 0x5a2   : > { %1964 = vadd.xlane.f32.xlu0 %v1963_v4 }
 0x5a8   : > { %v1305_v10 = vpop.xlane.xlu0 %1304 }
 0x5a9   : > { %2957 = vrcp.f32 %v1305_v10 }
 0x5ac   : > { %v1308_v42 = vpop.xlane.xlu1 %1307  ;;  %v1317_v26 = vpop.xlane.xlu0 %1316 }
 0x5ad   : > { %2959 = vrcp.f32 %v1308_v42 }
 0x5ae   : > { %1967 = vadd.xlane.f32.xlu1 %v1966_v16 }
 0x5b0   : > { %v1311_v59 = vpop.xlane.xlu1 %1310  ;;  %v1617_v32 = vpop.xlane.xlu0 %1616 }
 0x5b1   : > { %2961 = vrcp.f32 %v1311_v59 }
 0x5b4   : > { %v1314_v23 = vpop.xlane.xlu1 %1313  ;;  %v1620_v54 = vpop.xlane.xlu0 %1619 }
 0x5b5   : > { %2963 = vrcp.f32 %v1314_v23 }
 0x5b6   : > { %v2958_v40 = vpop.eup %2957 }
 0x5b7   : > { %v1335_v5 = vmul.f32 %v2958_v40, %v3578_v43 }
 0x5b8   : > { %v1320_v7 = vpop.xlane.xlu1 %1319  ;;  %v1623_v45 = vpop.xlane.xlu0 %1622 }
 0x5b9   : > { %2965 = vrcp.f32 %v1320_v7 }
 0x5ba   : > { %v2960_v1 = vpop.eup %2959  ;;  %2967 = vrcp.f32 %v1317_v26 }
 0x5bb   : > { %v1336_v6 = vmul.f32 %v2960_v1, %v3583_v61  ;;  %2969 = vrcp.f32 %v1620_v54 }
 0x5bc   : > { %2971 = vrcp.f32 %v1617_v32  ;;  %v1626_v43 = vpop.xlane.xlu0 %1625  ;;  %v1632_v29 = vpop.xlane.xlu1 %1631 }
 0x5bd   : > { %v1343_v46 = vpack.c.bf16 %v1336_v6, %v1335_v5  ;;  %2973 = vrcp.f32 %v1626_v43 }
 0x5be   : > { %v2962_v51 = vpop.eup %2961  ;;  %2975 = vrcp.f32 %v1623_v45 }
 0x5bf   : > { %2668 = vmatmul.mubr.msk.bf16.gmra.mxu1 %vm898_vm5, %v1343_v46  ;;  %v1337_v22 = vmul.f32 %v2962_v51, %v3590_v33 }
 0x5c0   : > { %2671 = vmatprep.mubr.msk.bf16.mxu1 %vm3018_vm0, %v3953_v35  ;;  %v1629_v31 = vpop.xlane.xlu0 %1628 }
 0x5c1   : > { %2977 = vrcp.f32 %v1629_v31 }
 0x5c2   : > { %v2964_v27 = vpop.eup %2963  ;;  %2979 = vrcp.f32 %v1632_v29 }
 0x5c3   : > { %v1338_v41 = vmul.f32 %v2964_v27, %v3598_v0 }
 0x5c5   : > { %v1344_v30 = vpack.c.bf16 %v1338_v41, %v1337_v22 }
 0x5c6   : > { %v2966_v34 = vpop.eup %2965 }
 0x5c7   : > { %2672 = vmatmul.mubr.msk.bf16.gmra.mxu1 %vm898_vm5, %v1344_v30  ;;  %v2968_v61 = vpop.eup %2967  ;;  %v1340_v24 = vmul.f32 %v2966_v34, %v3606_v52 }
 0x5c8   : > { %2675 = vmatprep.mubr.msk.bf16.mxu1 %vm3018_vm0, %v3953_v35  ;;  %v1339_v56 = vmul.f32 %v2968_v61, %v3588_v8  ;;  %v2970_v33 = vpop.eup %2969 }
 0x5c9   : > { %v2972_v0 = vpop.eup %2971  ;;  %v1656_v20 = vmul.f32 %v2970_v33, %v3604_v18 }
 0x5ca   : > { %v1345_v53 = vpack.c.bf16 %v1340_v24, %v1339_v56  ;;  %v1655_v52 = vmul.f32 %v2972_v0, %v3596_v39  ;;  %v2974_v17 = vpop.eup %2973 }
 0x5cb   : > { %v2976_v3 = vpop.eup %2975  ;;  %v1658_v39 = vmul.f32 %v2974_v17, %v3614_v21 }
 0x5cc   : > { %v1665_v58 = vpack.c.bf16 %v1656_v20, %v1655_v52  ;;  %v1657_v4 = vmul.f32 %v2976_v3, %v3612_v2 }
 0x5ce   : > { %v1635_v9 = vpop.xlane.xlu1 %1634  ;;  %v1666_v42 = vpack.c.bf16 %v1658_v39, %v1657_v4  ;;  %v2978_v16 = vpop.eup %2977 }
 0x5cf   : > { %2676 = vmatmul.mubr.msk.bf16.gmra.mxu1 %vm898_vm5, %v1345_v53  ;;  %v2980_v23 = vpop.eup %2979  ;;  %v1659_v40 = vmul.f32 %v2978_v16, %v3627_v50 }
 0x5d0   : > { %2707 = vmatprep.mubr.msk.bf16.mxu1 %vm3018_vm0, %v3953_v35  ;;  %v1660_v2 = vmul.f32 %v2980_v23, %v3620_v19 }
 0x5d1   : > { %v3746_v55 = vpop.f32.mrf.mxu1 }
 0x5d2   : > { %v1638_v38 = vpop.xlane.xlu1 %1637  ;;  %v1667_v1 = vpack.c.bf16 %v1660_v2, %v1659_v40 }
 0x5d3   : > { %v2613_v8 = vpop.f32.mrf.mxu1  ;;  %2981 = vrcp.f32 %v1638_v38 }
 0x5d4   : > { %2983 = vrcp.f32 %v1635_v9 }
 0x5d5   : > { %v3749_v48 = vpop.f32.mrf.mxu1 }
 0x5d6   : > { %v1113_v47 = vpack.c.bf16 %v3749_v48, %v3746_v55 }
 0x5d7   : > { %2708 = vmatmul.mubr.msk.bf16.vlgmr.msra.gmra.mxu1 %vm898_vm5, %v1665_v58  ;;  %v2614_v11 = vpop.f32.mrf.mxu1 }
 0x5d8   : > { %2711 = vmatprep.mubr.msk.bf16.mxu1 %vm3018_vm0, %v3953_v35 }
 0x5d9   : > { %v3757_v18 = vpop.f32.mrf.mxu1 }
 0x5da   : > { %v1641_v32 = vpop.xlane.xlu0 %1640 }
 0x5db   : > { %v2617_v10 = vpop.f32.mrf.mxu1 }
 0x5dd   : > { %v3760_v26 = vpop.f32.mrf.mxu1 }
 0x5de   : > { %v1114_v59 = vpack.c.bf16 %v3760_v26, %v3757_v18 }
 0x5df   : > { %2712 = vmatmul.mubr.msk.bf16.gmra.mxu1 %vm898_vm5, %v1666_v42  ;;  %v2618_v7 = vpop.f32.mrf.mxu1 }
 0x5e0   : > { %2715 = vmatprep.mubr.msk.bf16.mxu1 %vm3018_vm0, %v3953_v35  ;;  %v2982_v54 = vpop.eup %2981 }
 0x5e1   : > { %v2984_v5 = vpop.eup %2983  ;;  %v1662_v46 = vmul.f32 %v2982_v54, %v3643_v15 }
 0x5e2   : > { %v1644_v21 = vpop.xlane.xlu1 %1643  ;;  %v1661_v51 = vmul.f32 %v2984_v5, %v3638_v36 }
 0x5e3   : > { %2985 = vrcp.f32 %v1644_v21 }
 0x5e4   : > { %2987 = vrcp.f32 %v1641_v32  ;;  %v1668_v27 = vpack.c.bf16 %v1662_v46, %v1661_v51 }
 0x5e7   : > { %2716 = vmatmul.mubr.msk.bf16.gmra.mxu1 %vm898_vm5, %v1667_v1 }
 0x5e8   : > { %2719 = vmatprep.mubr.msk.bf16.mxu1 %vm3018_vm0, %v3953_v35 }
 0x5ea   : > { %v1941_v6 = vpop.xlane.xlu0 %1940 }
 0x5ee   : > { %v1944_v45 = vpop.xlane.xlu0 %1943 }
 0x5ef   : > { %2720 = vmatmul.mubr.msk.bf16.gmra.mxu1 %vm898_vm5, %v1668_v27  ;;  %2989 = vrcp.f32 %v1944_v45 }
 0x5f0   : > { %v2986_v50 = vpop.eup %2985  ;;  %2723 = vmatprep.mubr.msk.bf16.mxu1 %vm3018_vm0, %v3953_v35  ;;  %2991 = vrcp.f32 %v1941_v6 }
 0x5f1   : > { %v2988_v22 = vpop.eup %2987  ;;  %v1664_v41 = vmul.f32 %v2986_v50, %v3660_v12 }
 0x5f2   : > { %v1947_v19 = vpop.xlane.xlu0 %1946  ;;  %v1663_v30 = vmul.f32 %v2988_v22, %v3652_v14  ;;  %v1950_v34 = vpop.xlane.xlu1 %1949 }
 0x5f3   : > { %2993 = vrcp.f32 %v1947_v19 }
 0x5f4   : > { %v1669_v43 = vpack.c.bf16 %v1664_v41, %v1663_v30  ;;  %2995 = vrcp.f32 %v1950_v34 }
 0x5f6   : > { %v1953_v15 = vpop.xlane.xlu0 %1952 }
 0x5f7   : > { %2724 = vmatmul.mubr.msk.bf16.gmra.mxu1 %vm898_vm5, %v1669_v43 }
 0x5f8   : > { %2755 = vmatprep.mubr.msk.bf16.mxu1 %vm3018_vm0, %v3953_v35 }
 0x5fa   : > { %v1997_v36 = vpop.permute.xlu0 %1996  ;;  %v1956_v61 = vpop.xlane.xlu1 %1955 }
 0x5fb   : > { %v2015_v24 = vsel %vm1036_vm4, %v1997_v36, 0  ;;  %2997 = vrcp.f32 %v1956_v61 }
 0x5fc   : > { %2752 = vmatpush3.bf16.msra.mxu1 %v2015_v24  ;;  %v2990_v56 = vpop.eup %2989  ;;  %2999 = vrcp.f32 %v1953_v15 }
 0x5fd   : > { %2753 = vmatprep.subr.bf16.mxu1 %v3953_v35  ;;  %v2992_v33 = vpop.eup %2991  ;;  %v1980_v31 = vmul.f32 %v2990_v56, %v3676_v60 }
 0x5fe   : > { %v1959_v12 = vpop.xlane.xlu1 %1958  ;;  %v1979_v20 = vmul.f32 %v2992_v33, %v3671_v63 }
 0x600   : > { %v3784_v14 = vpop.f32.mrf.mxu1  ;;  %v2994_v58 = vpop.eup %2993  ;;  %v1989_v17 = vpack.c.bf16 %v1980_v31, %v1979_v20 }
 0x601   : > { %v2996_v38 = vpop.eup %2995  ;;  %v1981_v60 = vmul.f32 %v2994_v58, %v3681_v62 }
 0x602   : > { %v2621_v29 = vpop.f32.mrf.mxu1  ;;  %v1962_v53 = vpop.xlane.xlu1 %1961  ;;  %v1982_v3 = vmul.f32 %v2996_v38, %v3683_v37 }
 0x603   : > { %3001 = vrcp.f32 %v1962_v53 }
 0x604   : > { %v3787_v0 = vpop.f32.mrf.mxu1  ;;  %3003 = vrcp.f32 %v1959_v12  ;;  %v1990_v39 = vpack.c.bf16 %v1982_v3, %v1981_v60 }
 0x605   : > { %v1115_v9 = vpack.c.bf16 %v3787_v0, %v3784_v14 }
 0x606   : > { %v2622_v52 = vpop.f32.mrf.mxu1  ;;  %v1995_v8 = vpop.permute.xlu1 %1994 }
 0x607   : > { %2754 = vmatpush3.bf16.msra.mxu1 %v1995_v8 }
 0x608   : > { %v2998_v4 = vpop.eup %2997 }
 0x609   : > { %v3000_v42 = vpop.eup %2999  ;;  %v1984_v37 = vmul.f32 %v2998_v4, %v3693_v25 }
 0x60a   : > { %2756 = vmatmul.mubr.msk.bf16.vlgmr.msra.gmra.mxu1 %vm898_vm5, %v1989_v17  ;;  %v1983_v23 = vmul.f32 %v3000_v42, %v3689_v28  ;;  %v2841_v42 = vld [vmem:[%s3942_s8 + $0x8] sm:$0xff]  }
 0x60b   : > { %2759 = vmatprep.mubr.msk.bf16.mxu1 %vm3018_vm0, %v3953_v35  ;;  %2776 = vmatpush3.bf16.msra.mxu0 %v2841_v42 }
 0x60c   : > { %v1991_v32 = vpack.c.bf16 %v1984_v37, %v1983_v23  ;;  %v2842_v37 = vld [vmem:[%s3942_s8] sm:$0xff]   ;;  %2777 = vmatprep.subr.bf16.mxu0 %v3953_v35 }
 0x60d   : > { %v3797_v11 = vpop.f32.mrf.mxu1 }
 0x60f   : > { %v2625_v63 = vpop.f32.mrf.mxu1  ;;  %2778 = vmatpush3.bf16.msra.mxu0 %v2842_v37 }
 0x610   : > { %v3002_v7 = vpop.eup %3001 }
 0x611   : > { %v3799_v10 = vpop.f32.mrf.mxu1  ;;  %v3004_v21 = vpop.eup %3003  ;;  %v1986_v40 = vmul.f32 %v3002_v7, %v3701_v49 }
 0x612   : > { %2760 = vmatmul.mubr.msk.bf16.gmra.mxu1 %vm898_vm5, %v1990_v39  ;;  %v1116_v16 = vpack.c.bf16 %v3799_v10, %v3797_v11  ;;  %v1985_v1 = vmul.f32 %v3004_v21, %v3697_v44 }
 0x613   : > { %2763 = vmatprep.mubr.msk.bf16.mxu1 %vm3018_vm0, %v3953_v35  ;;  %v2626_v62 = vpop.f32.mrf.mxu1 }
 0x614   : > { %v1992_v5 = vpack.c.bf16 %v1986_v40, %v1985_v1 }
 0x61a   : > { %2764 = vmatmul.mubr.msk.bf16.gmra.mxu1 %vm898_vm5, %v1991_v32 }
 0x61b   : > { %2767 = vmatprep.mubr.msk.bf16.mxu1 %vm3018_vm0, %v3953_v35 }
 0x61d   : > { %v3812_v2 = vpop.f32.mrf.mxu1 }
 0x61f   : > { %v2629_v54 = vpop.f32.mrf.mxu1 }
 0x621   : > { %v3815_v6 = vpop.f32.mrf.mxu1 }
 0x622   : > { %v1117_v28 = vpack.c.bf16 %v3815_v6, %v3812_v2  ;;  %2768 = vmatmul.mubr.msk.bf16.gmra.mxu1 %vm898_vm5, %v1992_v5 }
 0x623   : > { %v2630_v25 = vpop.f32.mrf.mxu1  ;;  %2771 = vmatprep.mubr.msk.bf16.mxu1 %vm3018_vm0, %v3953_v35 }
 0x62b   : > { %v1965_v46 = vpop.xlane.xlu0 %1964 }
 0x62c   : > { %3005 = vrcp.f32 %v1965_v46 }
 0x637   : > { %v1968_v49 = vpop.xlane.xlu1 %1967 }
 0x638   : > { %3007 = vrcp.f32 %v1968_v49 }
 0x639   : > { %v3006_v45 = vpop.eup %3005 }
 0x63a   : > { %v1987_v22 = vmul.f32 %v3006_v45, %v3722_v13 }
 0x642   : > { %v1403_v51 = vpop.f32.mrf.mxu1 }
 0x644   : > { %v2661_v44 = vpop.f32.mrf.mxu1 }
 0x645   : > { %v3008_v27 = vpop.eup %3007 }
 0x646   : > { %v1406_v50 = vpop.f32.mrf.mxu1  ;;  %v1988_v19 = vmul.f32 %v3008_v27, %v3726_v57 }
 0x647   : > { %v1442_v41 = vpack.c.bf16 %v1406_v50, %v1403_v51 }
 0x648   : > { %v2662_v30 = vpop.f32.mrf.mxu1  ;;  %v1993_v34 = vpack.c.bf16 %v1988_v19, %v1987_v22 }
 0x649   : > { %2100 = vrot.lane.b32.xlu0 %v1442_v41, %s3026_s25 }
 0x64a   : > { %v1411_v15 = vpop.f32.mrf.mxu1  ;;  %2772 = vmatmul.mubr.msk.bf16.gmra.mxu1 %vm898_vm5, %v1993_v34 }
 0x64c   : > { %v2665_v43 = vpop.f32.mrf.mxu1 }
 0x64e   : > { %v1414_v36 = vpop.f32.mrf.mxu1 }
 0x64f   : > { %v1443_v61 = vpack.c.bf16 %v1414_v36, %v1411_v15 }
 0x650   : > { %v2666_v24 = vpop.f32.mrf.mxu1 }
 0x67f   : > { %v1419_v12 = vpop.f32.mrf.mxu1 }
 0x681   : > { %v2669_v56 = vpop.f32.mrf.mxu1 }
 0x683   : > { %v1422_v29 = vpop.f32.mrf.mxu1 }
 0x684   : > { %v1444_v1 = vpack.c.bf16 %v1422_v29, %v1419_v12 }
 0x685   : > { %v2670_v53 = vpop.f32.mrf.mxu1 }
 0x687   : > { %v3826_v13 = vpop.f32.mrf.mxu1 }
 0x689   : > { %v2673_v57 = vpop.f32.mrf.mxu1 }
 0x68b   : > { %v1430_v33 = vpop.f32.mrf.mxu1 }
 0x68c   : > { %v1445_v31 = vpack.c.bf16 %v1430_v33, %v3826_v13 }
 0x68d   : > { %v2674_v20 = vpop.f32.mrf.mxu1 }
 0x68f   : > { %v3829_v52 = vpop.f32.mrf.mxu1 }
 0x691   : > { %v2677_v8 = vpop.f32.mrf.mxu1 }
 0x693   : > { %v3831_v58 = vpop.f32.mrf.mxu1 }
 0x694   : > { %v1446_v17 = vpack.c.bf16 %v3831_v58, %v3829_v52 }
 0x695   : > { %v2678_v38 = vpop.f32.mrf.mxu1 }
 0x697   : > { %v1727_v60 = vpop.f32.mrf.mxu1 }
 0x699   : > { %v2709_v3 = vpop.f32.mrf.mxu1 }
 0x69b   : > { %v1730_v63 = vpop.f32.mrf.mxu1 }
 0x69c   : > { %v1766_v39 = vpack.c.bf16 %v1730_v63, %v1727_v60 }
 0x69d   : > { %v2710_v4 = vpop.f32.mrf.mxu1 }
 0x69e   : > { %2115 = vrot.lane.b32.xlu1 %v1766_v39, %s3027_s27 }
 0x69f   : > { %v1735_v62 = vpop.f32.mrf.mxu1 }
 0x6a1   : > { %v2713_v23 = vpop.f32.mrf.mxu1 }
 0x6a3   : > { %v1738_v32 = vpop.f32.mrf.mxu1 }
 0x6a4   : > { %v1767_v7 = vpack.c.bf16 %v1738_v32, %v1735_v62 }
 0x6a5   : > { %v2714_v21 = vpop.f32.mrf.mxu1 }
 0x6a6   : > { %2117 = vrot.lane.b32.xlu1 %v1767_v7, %s3027_s27 }
 0x6a7   : > { %v1743_v40 = vpop.f32.mrf.mxu1 }
 0x6a9   : > { %v2717_v54 = vpop.f32.mrf.mxu1 }
 0x6aa   : > { %2104 = vrot.lane.b32.xlu1 %v1444_v1, %s3026_s25 }
 0x6ab   : > { %v1746_v5 = vpop.f32.mrf.mxu1 }
 0x6ac   : > { %v1768_v53 = vpack.c.bf16 %v1746_v5, %v1743_v40 }
 0x6ad   : > { %v2718_v25 = vpop.f32.mrf.mxu1 }
 0x6af   : > { %v1751_v46 = vpop.f32.mrf.mxu1 }
 0x6b1   : > { %v2721_v49 = vpop.f32.mrf.mxu1 }
 0x6b3   : > { %v1754_v51 = vpop.f32.mrf.mxu1 }
 0x6b4   : > { %v1769_v38 = vpack.c.bf16 %v1754_v51, %v1751_v46 }
 0x6b5   : > { %v2722_v45 = vpop.f32.mrf.mxu1 }
 0x6b7   : > { %v1759_v44 = vpop.f32.mrf.mxu1 }
 0x6b9   : > { %v2725_v27 = vpop.f32.mrf.mxu1 }
 0x6bb   : > { %v1762_v50 = vpop.f32.mrf.mxu1  ;;  %v2101_v23 = vpop.permute.xlu0 %2100 }
 0x6bc   : > { %v1770_v39 = vpack.c.bf16 %v1762_v50, %v1759_v44  ;;  %v2142_v52 = vsel %vm803_vm3, %v1113_v47, %v2101_v23  ;;  %v2437_v50 = vld [vmem:[%s3943_s9] ss:$0 sm:$0xff] }
 0x6bd   : > { %v2726_v22 = vpop.f32.mrf.mxu1 }
 0x6ca   : > { %v2051_v19 = vpop.f32.mrf.mxu1 }
 0x6cc   : > { %v2757_v41 = vpop.f32.mrf.mxu1 }
 0x6ce   : > { %v2054_v30 = vpop.f32.mrf.mxu1 }
 0x6cf   : > { %v2090_v34 = vpack.c.bf16 %v2054_v30, %v2051_v19 }
 0x6d0   : > { %v2758_v15 = vpop.f32.mrf.mxu1 }
 0x6d1   : > { %2130 = vrot.lane.b32.xlu0 %v2090_v34, %s3028_s30 }
 0x6d2   : > { %v2059_v43 = vpop.f32.mrf.mxu1 }
 0x6d4   : > { %v2761_v36 = vpop.f32.mrf.mxu1 }
 0x6d5   : > { %2102 = vrot.lane.b32.xlu0 %v1443_v61, %s3026_s25 }
 0x6d6   : > { %v2062_v24 = vpop.f32.mrf.mxu1 }
 0x6d7   : > { %v2091_v12 = vpack.c.bf16 %v2062_v24, %v2059_v43 }
 0x6d8   : > { %v2762_v56 = vpop.f32.mrf.mxu1 }
 0x6d9   : > { %2132 = vrot.lane.b32.xlu0 %v2091_v12, %s3028_s30 }
 0x6da   : > { %v2067_v29 = vpop.f32.mrf.mxu1 }
 0x6dc   : > { %v2765_v13 = vpop.f32.mrf.mxu1 }
 0x6dd   : > { %2119 = vrot.lane.b32.xlu0 %v1768_v53, %s3027_s27 }
 0x6de   : > { %v2070_v57 = vpop.f32.mrf.mxu1 }
 0x6df   : > { %v2092_v33 = vpack.c.bf16 %v2070_v57, %v2067_v29 }
 0x6e0   : > { %v2766_v20 = vpop.f32.mrf.mxu1 }
 0x6e1   : > { %2106 = vrot.lane.b32.xlu0 %v1445_v31, %s3026_s25  ;;  %2134 = vrot.lane.b32.xlu1 %v2092_v33, %s3028_s30 }
 0x6e2   : > { %v2075_v8 = vpop.f32.mrf.mxu1 }
 0x6e4   : > { %v2769_v61 = vpop.f32.mrf.mxu1 }
 0x6e5   : > { %2121 = vrot.lane.b32.xlu1 %v1769_v38, %s3027_s27 }
 0x6e6   : > { %v2078_v60 = vpop.f32.mrf.mxu1 }
 0x6e7   : > { %v2093_v3 = vpack.c.bf16 %v2078_v60, %v2075_v8 }
 0x6e8   : > { %v2770_v63 = vpop.f32.mrf.mxu1 }
 0x6e9   : > { %2108 = vrot.lane.b32.xlu1 %v1446_v17, %s3026_s25  ;;  %2136 = vrot.lane.b32.xlu0 %v2093_v3, %s3028_s30 }
 0x6ed   : > { %2123 = vrot.lane.b32.xlu0 %v1770_v39, %s3027_s27 }
 0x70a   : > { %v2083_v31 = vpop.f32.mrf.mxu1 }
 0x70c   : > { %v2773_v4 = vpop.f32.mrf.mxu1 }
 0x70e   : > { %v2086_v42 = vpop.f32.mrf.mxu1 }
 0x70f   : > { %v2094_v62 = vpack.c.bf16 %v2086_v42, %v2083_v31 }
 0x710   : > { %v2774_v37 = vpop.f32.mrf.mxu1  ;;  %v2116_v32 = vpop.permute.xlu1 %2115 }
 0x711   : > { %2138 = vrot.lane.b32.xlu1 %v2094_v62, %s3028_s30  ;;  %v2157_v58 = vsel %vm2155_vm6, %v2142_v52, %v2116_v32 }
 0x718   : > { %v2118_v1 = vpop.permute.xlu1 %2117 }
 0x71c   : > { %v2105_v54 = vpop.permute.xlu1 %2104 }
 0x71d   : > { %v2148_v18 = vsel %vm803_vm3, %v1115_v9, %v2105_v54 }
 0x743   : > { %v2131_v17 = vpop.permute.xlu0 %2130 }
 0x744   : > { %v2168_v7 = vsel %vm2166_vm7, %v2157_v58, %v2131_v17 }
 0x745   : > { %2780 = vmatmul.mubr.msk.bf16.vlgmr.msra.gmra.mxu0 %vm432_vm1, %v2168_v7 }
 0x746   : > { %2783 = vmatprep.mubr.msk.bf16.mxu0 %vm3018_vm0, %v3953_v35 }
 0x747   : > { %v2103_v21 = vpop.permute.xlu0 %2102 }
 0x748   : > { %v2145_v40 = vsel %vm803_vm3, %v1114_v59, %v2103_v21 }
 0x749   : > { %v2159_v48 = vsel %vm2155_vm6, %v2145_v40, %v2118_v1 }
 0x74b   : > { %v2133_v55 = vpop.permute.xlu0 %2132 }
 0x74c   : > { %v2170_v47 = vsel %vm2166_vm7, %v2159_v48, %v2133_v55 }
 0x74d   : > { %2784 = vmatmul.mubr.msk.bf16.gmra.mxu0 %vm432_vm1, %v2170_v47 }
 0x74e   : > { %2787 = vmatprep.mubr.msk.bf16.mxu0 %vm3018_vm0, %v3953_v35 }
 0x74f   : > { %v2120_v5 = vpop.permute.xlu0 %2119 }
 0x750   : > { %v2161_v26 = vsel %vm2155_vm6, %v2148_v18, %v2120_v5 }
 0x753   : > { %v2135_v59 = vpop.permute.xlu1 %2134  ;;  %v2107_v46 = vpop.permute.xlu0 %2106 }
 0x754   : > { %v2172_v25 = vsel %vm2166_vm7, %v2161_v26, %v2135_v59  ;;  %v2151_v14 = vsel %vm803_vm3, %v1116_v16, %v2107_v46 }
 0x755   : > { %2788 = vmatmul.mubr.msk.bf16.gmra.mxu0 %vm432_vm1, %v2172_v25 }
 0x756   : > { %2791 = vmatprep.mubr.msk.bf16.mxu0 %vm3018_vm0, %v3953_v35 }
 0x757   : > { %v2122_v49 = vpop.permute.xlu1 %2121 }
 0x758   : > { %v2163_v0 = vsel %vm2155_vm6, %v2151_v14, %v2122_v49 }
 0x75b   : > { %v2137_v9 = vpop.permute.xlu0 %2136  ;;  %v2109_v45 = vpop.permute.xlu1 %2108 }
 0x75c   : > { %v2174_v51 = vsel %vm2166_vm7, %v2163_v0, %v2137_v9  ;;  %v2154_v44 = vsel %vm803_vm3, %v1117_v28, %v2109_v45 }
 0x75d   : > { %2792 = vmatmul.mubr.msk.bf16.gmra.mxu0 %vm432_vm1, %v2174_v51 }
 0x75e   : > { %2795 = vmatprep.mubr.msk.bf16.mxu0 %vm3018_vm0, %v3953_v35 }
 0x75f   : > { %v2124_v27 = vpop.permute.xlu0 %2123 }
 0x760   : > { %v2165_v11 = vsel %vm2155_vm6, %v2154_v44, %v2124_v27 }
 0x783   : > { %v2139_v10 = vpop.permute.xlu1 %2138 }
 0x784   : > { %v2176_v16 = vsel %vm2166_vm7, %v2165_v11, %v2139_v10 }
 0x785   : > { %2796 = vmatmul.mubr.msk.bf16.gmra.mxu0 %vm432_vm1, %v2176_v16 }
 0x805   : > { %v2244_v35 = vpop.f32.mrf.mxu0 }
 0x806   : > { %v2245_v2 = vadd.f32 %v2437_v50, %v2244_v35 }
 0x807   : > { %v2781_v6 = vpop.f32.mrf.mxu0 }
 0x808   : > { %2283 = vst.msk [vmem:[%s3909_s18] sm:$0xff] %vm432_vm1, %v2245_v2 }
 0x809   : > { %v2247_v28 = vpop.f32.mrf.mxu0 }
 0x80a   : > { %v2248_v22 = vadd.f32 %v2437_v50, %v2247_v28 }
 0x80b   : > { %v2782_v19 = vpop.f32.mrf.mxu0 }
 0x80c   : > { %2284 = vst.msk [vmem:[%s3909_s18 + $0x8] sm:$0xff] %vm432_vm1, %v2248_v22 }
 0x80d   : > { %v2252_v41 = vpop.f32.mrf.mxu0 }
 0x80e   : > { %v2253_v30 = vadd.f32 %v2437_v50, %v2252_v41 }
 0x80f   : > { %v2785_v34 = vpop.f32.mrf.mxu0 }
 0x810   : > { %2285 = vst.msk [vmem:[%s3909_s18 + $0x10] sm:$0xff] %vm432_vm1, %v2253_v30 }
 0x811   : > { %v2255_v15 = vpop.f32.mrf.mxu0 }
 0x812   : > { %v2256_v43 = vadd.f32 %v2437_v50, %v2255_v15 }
 0x813   : > { %v2786_v36 = vpop.f32.mrf.mxu0 }
 0x814   : > { %2286 = vst.msk [vmem:[%s3909_s18 + $0x18] sm:$0xff] %vm432_vm1, %v2256_v43 }
 0x815   : > { %v2260_v24 = vpop.f32.mrf.mxu0 }
 0x816   : > { %v2261_v12 = vadd.f32 %v2437_v50, %v2260_v24 }
 0x817   : > { %v2789_v56 = vpop.f32.mrf.mxu0 }
 0x818   : > { %2287 = vst.msk [vmem:[%s3909_s18 + $0x20] sm:$0xff] %vm432_vm1, %v2261_v12 }
 0x819   : > { %v2263_v29 = vpop.f32.mrf.mxu0 }
 0x81a   : > { %v2264_v53 = vadd.f32 %v2437_v50, %v2263_v29 }
 0x81b   : > { %v2790_v13 = vpop.f32.mrf.mxu0 }
 0x81c   : > { %2288 = vst.msk [vmem:[%s3909_s18 + $0x28] sm:$0xff] %vm432_vm1, %v2264_v53 }
 0x81d   : > { %v2268_v57 = vpop.f32.mrf.mxu0 }
 0x81e   : > { %v2269_v33 = vadd.f32 %v2437_v50, %v2268_v57 }
 0x81f   : > { %v2793_v20 = vpop.f32.mrf.mxu0 }
 0x820   : > { %2289 = vst.msk [vmem:[%s3909_s18 + $0x30] sm:$0xff] %vm432_vm1, %v2269_v33 }
 0x821   : > { %v2271_v8 = vpop.f32.mrf.mxu0 }
 0x822   : > { %v2272_v38 = vadd.f32 %v2437_v50, %v2271_v8 }
 0x823   : > { %v2794_v61 = vpop.f32.mrf.mxu0 }
 0x824   : > { %2290 = vst.msk [vmem:[%s3909_s18 + $0x38] sm:$0xff] %vm432_vm1, %v2272_v38 }
 0x845   : > { %v2276_v60 = vpop.f32.mrf.mxu0 }
 0x846   : > { %v2277_v3 = vadd.f32 %v2437_v50, %v2276_v60 }
 0x847   : > { %v2797_v63 = vpop.f32.mrf.mxu0 }
 0x848   : > { %2291 = vst.msk [vmem:[%s3909_s18 + $0x40] sm:$0xff] %vm432_vm1, %v2277_v3 }
 0x849   : > { %v2279_v39 = vpop.f32.mrf.mxu0 }
 0x84a   : > { %v2280_v31 = vadd.f32 %v2437_v50, %v2279_v39 }
 0x84b   : > { %v2798_v4 = vpop.f32.mrf.mxu0 }
 0x84c   : > { %2292 = vst.msk [vmem:[%s3909_s18 + $0x48] sm:$0xff] %vm432_vm1, %v2280_v31 }
 0x84d PF: > { %s20_s13 = sadd.s32 1, %s3015_s13  }
 0x84e   : > { %p17_p4 = scmp.ge.s32.totalorder %s20_s13, 4  }
 0x850   :  { %19 = sbr.rel (!%p17_p4) target bundleno = 1 (0x1), region = 93 }

</bundles_post_ra>
